<compile_context>
chip_gen: v5e
topology: v5e:2x2
jax: 0.10.0
libtpu: 0.0.40
codegen_flags: <defaults>
</compile_context>

<pallas_src>
import jax
import jax.numpy as jnp
from jax.experimental import pallas as pl
from jax.experimental.pallas import tpu as pltpu


def vector_decoder_kernel(z_ref, w01_ref, b01_ref, w2_ref, b2_ref, w3_ref, b3_ref, o_ref):
    # bf16 operands on the MXU, f32 accumulation throughout.
    z = z_ref[...].astype(jnp.bfloat16)                                  # [TB, L]

    # Fused Linear(L->L) ; Linear(L->H) via folded (W01, b01), then LeakyReLU(0.01)
    h = jnp.dot(z, w01_ref[...], preferred_element_type=jnp.float32) + b01_ref[...]
    h = jnp.maximum(h, 0.01 * h).astype(jnp.bfloat16)                    # [TB, H]

    # Linear(H -> H) + LeakyReLU(0.01)
    h = jnp.dot(h, w2_ref[...], preferred_element_type=jnp.float32) + b2_ref[...]
    h = jnp.maximum(h, 0.01 * h).astype(jnp.bfloat16)                    # [TB, H]

    # Linear(H -> Dp)  (Dp = state_dim zero-padded to 128 lanes -> unmasked stores)
    out = jnp.dot(h, w3_ref[...], preferred_element_type=jnp.float32) + b3_ref[...]
    o_ref[...] = out.astype(o_ref.dtype)


def _choose_batch_tile(B, tb):
    """Pick batch tile TB and grid so that (a) step count is minimal, (b) when more than
    one step is needed the grid length is even (v7x megacore gets both TCs busy)."""
    if B <= tb:
        return B, 1                       # single step; block == full batch dim
    n = -(-B // tb)                       # ceil
    if n % 2:
        n += 1                            # even grid for v7x "parallel" axis
    TB = -(-B // n)
    TB = -(-TB // 8) * 8                  # sublane multiple of 8
    return TB, -(-B // TB)


def vector_decoder_forward(z, kparams, state_dim, *, tb=1024):
    """z: [B, latent_dim] f32. kparams from prepare_params(). Returns [B, state_dim] f32."""
    w01, b01, w2, b2, w3p, b3p = kparams
    B, L = z.shape
    H = w2.shape[0]
    Dp = w3p.shape[1]                     # 128-lane-padded output width

    TB, n_steps = _choose_batch_tile(B, tb)
    grid = (n_steps,)

    batch_spec = lambda feat: pl.BlockSpec((TB, feat), lambda i: (i, 0))
    const_spec = lambda arr: pl.BlockSpec(arr.shape, lambda i: (0, 0))   # VMEM-resident

    flops = int(2 * B * (L * H + H * H + H * Dp))
    weight_bytes = sum(int(a.size) * a.dtype.itemsize for a in kparams)
    bytes_accessed = int(z.size) * 4 + B * Dp * 4 + weight_bytes

    out = pl.pallas_call(
        vector_decoder_kernel,
        out_shape=jax.ShapeDtypeStruct((B, Dp), jnp.float32),
        grid=grid,
        in_specs=[
            batch_spec(L),
            const_spec(w01), const_spec(b01),
            const_spec(w2), const_spec(b2),
            const_spec(w3p), const_spec(b3p),
        ],
        out_specs=batch_spec(Dp),
        compiler_params=pltpu.CompilerParams(
            dimension_semantics=("parallel",)),   # v7x: shard batch tiles across both TCs
        cost_estimate=pl.CostEstimate(
            flops=flops, transcendentals=0, bytes_accessed=bytes_accessed),
    )(z, w01, b01, w2, b2, w3p, b3p)

    return out[:, :state_dim]


def init_params(key, latent_dim, state_dim, hidden_dim):
    """PyTorch nn.Linear default init (uniform +-1/sqrt(fan_in)); f32, [in, out] layout."""
    def linear(k, fan_in, fan_out):
        k_w, k_b = jax.random.split(k)
        bound = 1.0 / jnp.sqrt(fan_in)
        w = jax.random.uniform(k_w, (fan_in, fan_out), jnp.float32, -bound, bound)
        b = jax.random.uniform(k_b, (1, fan_out), jnp.float32, -bound, bound)
        return w, b

    k0, k1, k2, k3 = jax.random.split(key, 4)
    return (linear(k0, latent_dim, latent_dim),
            linear(k1, latent_dim, hidden_dim),
            linear(k2, hidden_dim, hidden_dim),
            linear(k3, hidden_dim, state_dim))


def prepare_params(raw_params, state_dim):
    """Kernel-ready params: layer0 folded into layer1 (f32 fold, bf16 store) and the final
    layer zero-padded to 128 output lanes for lane-dense stores."""
    (w0, b0), (w1, b1), (w2, b2), (w3, b3) = raw_params

    w01 = (w0 @ w1).astype(jnp.bfloat16)                     # [L, H] bf16
    b01 = b0 @ w1 + b1                                       # [1, H] f32

    d_pad = -(-state_dim // 128) * 128                       # >= 128, multiple of 128
    w3p = jnp.zeros((w3.shape[0], d_pad), jnp.float32).at[:, :state_dim].set(w3)
    b3p = jnp.zeros((1, d_pad), jnp.float32).at[:, :state_dim].set(b3)

    return (w01, b01, w2.astype(jnp.bfloat16), b2, w3p.astype(jnp.bfloat16), b3p)


def reference_forward(z, kparams, state_dim):
    """Pure-JAX reference using the same folded params / bf16-operand / f32-acc arithmetic."""
    w01, b01, w2, b2, w3p, b3p = kparams

    def lin(x, w, b):
        return jnp.dot(x.astype(jnp.bfloat16), w, preferred_element_type=jnp.float32) + b

    h = lin(z, w01, b01)
    h = jnp.maximum(h, 0.01 * h)
    h = lin(h, w2, b2)
    h = jnp.maximum(h, 0.01 * h)
    out = lin(h, w3p, b3p)
    return out[:, :state_dim]


if __name__ == "__main__":
    latent_dim = 32
    state_dim = 24          # state_shape = (24,)  -> vector observation
    hidden_dim = 256        # layers_dim = [256, 256]
    batch = 1000            # with tb=384: even 4-step grid + ragged last tile exercised

    key = jax.random.PRNGKey(0)
    k_z, k_p = jax.random.split(key)
    z = jax.random.normal(k_z, (batch, latent_dim), jnp.float32)
    raw_params = init_params(k_p, latent_dim, state_dim, hidden_dim)
    kparams = prepare_params(raw_params, state_dim)

    out = jax.block_until_ready(
        vector_decoder_forward(z, kparams, state_dim, tb=384))
    ref = reference_forward(z, kparams, state_dim)

    assert out.shape == (batch, state_dim)
    assert jnp.allclose(out, ref, atol=1e-3, rtol=1e-3), "mismatch vs reference"

    print("KERNEL_OK")
</pallas_src>

<mosaic_0001>
module attributes {stable_mosaic.version = 11 : i64} {
  func.func @vector_decoder_kernel(%arg0: i32, %arg1: memref<256x32xf32, #tpu.memory_space<vmem>>, %arg2: memref<32x256xbf16, #tpu.memory_space<vmem>>, %arg3: memref<1x256xf32, #tpu.memory_space<vmem>>, %arg4: memref<256x256xbf16, #tpu.memory_space<vmem>>, %arg5: memref<1x256xf32, #tpu.memory_space<vmem>>, %arg6: memref<256x128xbf16, #tpu.memory_space<vmem>>, %arg7: memref<1x128xf32, #tpu.memory_space<vmem>>, %arg8: memref<256x128xf32, #tpu.memory_space<vmem>>) attributes {dimension_semantics = [#tpu.dimension_semantics<parallel>], iteration_bounds = array<i64: 4>, scalar_prefetch = 0 : i64, scratch_operands = 0 : i64, tpu.core_type = #tpu.core_type<tc>, window_params = [{transform_indices = @transform_0, window_bounds = array<i64: 256, 32>}, {pipeline_mode = #tpu.pipeline_mode<synchronous>, transform_indices = @transform_1, window_bounds = array<i64: 32, 256>}, {pipeline_mode = #tpu.pipeline_mode<synchronous>, transform_indices = @transform_2, window_bounds = array<i64: 1, 256>}, {pipeline_mode = #tpu.pipeline_mode<synchronous>, transform_indices = @transform_3, window_bounds = array<i64: 256, 256>}, {pipeline_mode = #tpu.pipeline_mode<synchronous>, transform_indices = @transform_4, window_bounds = array<i64: 1, 256>}, {pipeline_mode = #tpu.pipeline_mode<synchronous>, transform_indices = @transform_5, window_bounds = array<i64: 256, 128>}, {pipeline_mode = #tpu.pipeline_mode<synchronous>, transform_indices = @transform_6, window_bounds = array<i64: 1, 128>}, {transform_indices = @transform_7, window_bounds = array<i64: 256, 128>}]} {
    %c0 = arith.constant 0 : index
    %c0_0 = arith.constant 0 : index
    %0 = vector.load %arg1[%c0, %c0_0] : memref<256x32xf32, #tpu.memory_space<vmem>>, vector<256x32xf32>
    %1 = arith.truncf %0 : vector<256x32xf32> to vector<256x32xbf16>
    %c0_1 = arith.constant 0 : index
    %c0_2 = arith.constant 0 : index
    %2 = vector.load %arg2[%c0_1, %c0_2] : memref<32x256xbf16, #tpu.memory_space<vmem>>, vector<32x256xbf16>
    %cst = arith.constant dense<0.000000e+00> : vector<256x256xf32>
    %3 = tpu.matmul %1, %2, %cst {dimension_numbers = #tpu.dot_dimension_numbers<[1], [0], [0], [1], [0, 0, 1, 1], [], []>} : vector<256x32xbf16>, vector<32x256xbf16>, vector<256x256xf32> -> vector<256x256xf32>
    %c0_3 = arith.constant 0 : index
    %c0_4 = arith.constant 0 : index
    %4 = vector.load %arg3[%c0_3, %c0_4] : memref<1x256xf32, #tpu.memory_space<vmem>>, vector<1x256xf32>
    %5 = vector.broadcast %4 : vector<1x256xf32> to vector<256x256xf32>
    %6 = arith.addf %3, %5 : vector<256x256xf32>
    %cst_5 = arith.constant 0.00999999977 : f32
    %7 = vector.broadcast %cst_5 : f32 to vector<256x256xf32>
    %8 = arith.mulf %7, %6 : vector<256x256xf32>
    %9 = arith.maximumf %6, %8 : vector<256x256xf32>
    %10 = arith.truncf %9 : vector<256x256xf32> to vector<256x256xbf16>
    %c0_6 = arith.constant 0 : index
    %c0_7 = arith.constant 0 : index
    %11 = vector.load %arg4[%c0_6, %c0_7] : memref<256x256xbf16, #tpu.memory_space<vmem>>, vector<256x256xbf16>
    %cst_8 = arith.constant dense<0.000000e+00> : vector<256x256xf32>
    %12 = tpu.matmul %10, %11, %cst_8 {dimension_numbers = #tpu.dot_dimension_numbers<[1], [0], [0], [1], [0, 0, 1, 1], [], []>} : vector<256x256xbf16>, vector<256x256xbf16>, vector<256x256xf32> -> vector<256x256xf32>
    %c0_9 = arith.constant 0 : index
    %c0_10 = arith.constant 0 : index
    %13 = vector.load %arg5[%c0_9, %c0_10] : memref<1x256xf32, #tpu.memory_space<vmem>>, vector<1x256xf32>
    %14 = vector.broadcast %13 : vector<1x256xf32> to vector<256x256xf32>
    %15 = arith.addf %12, %14 : vector<256x256xf32>
    %cst_11 = arith.constant 0.00999999977 : f32
    %16 = vector.broadcast %cst_11 : f32 to vector<256x256xf32>
    %17 = arith.mulf %16, %15 : vector<256x256xf32>
    %18 = arith.maximumf %15, %17 : vector<256x256xf32>
    %19 = arith.truncf %18 : vector<256x256xf32> to vector<256x256xbf16>
    %c0_12 = arith.constant 0 : index
    %c0_13 = arith.constant 0 : index
    %20 = vector.load %arg6[%c0_12, %c0_13] : memref<256x128xbf16, #tpu.memory_space<vmem>>, vector<256x128xbf16>
    %cst_14 = arith.constant dense<0.000000e+00> : vector<256x128xf32>
    %21 = tpu.matmul %19, %20, %cst_14 {dimension_numbers = #tpu.dot_dimension_numbers<[1], [0], [0], [1], [0, 0, 1, 1], [], []>} : vector<256x256xbf16>, vector<256x128xbf16>, vector<256x128xf32> -> vector<256x128xf32>
    %c0_15 = arith.constant 0 : index
    %c0_16 = arith.constant 0 : index
    %22 = vector.load %arg7[%c0_15, %c0_16] : memref<1x128xf32, #tpu.memory_space<vmem>>, vector<1x128xf32>
    %23 = vector.broadcast %22 : vector<1x128xf32> to vector<256x128xf32>
    %24 = arith.addf %21, %23 : vector<256x128xf32>
    %c0_17 = arith.constant 0 : index
    %c0_18 = arith.constant 0 : index
    %25 = vector.load %arg8[%c0_17, %c0_18] : memref<256x128xf32, #tpu.memory_space<vmem>>, vector<256x128xf32>
    tpu.vector_store %arg8[%c0_17, %c0_18], %24 {strides = array<i32>} : memref<256x128xf32, #tpu.memory_space<vmem>>, vector<256x128xf32>,
    return
  }
  func.func @transform_0(%arg0: i32) -> (i32, i32) {
    %c0_i32 = arith.constant 0 : i32
    %c0_i32_0 = arith.constant 0 : i32
    return %arg0, %c0_i32 : i32, i32
  }
  func.func @transform_1(%arg0: i32) -> (i32, i32) {
    %c0_i32 = arith.constant 0 : i32
    %c0_i32_0 = arith.constant 0 : i32
    %c0_i32_1 = arith.constant 0 : i32
    return %c0_i32, %c0_i32_0 : i32, i32
  }
  func.func @transform_2(%arg0: i32) -> (i32, i32) {
    %c0_i32 = arith.constant 0 : i32
    %c0_i32_0 = arith.constant 0 : i32
    %c0_i32_1 = arith.constant 0 : i32
    return %c0_i32, %c0_i32_0 : i32, i32
  }
  func.func @transform_3(%arg0: i32) -> (i32, i32) {
    %c0_i32 = arith.constant 0 : i32
    %c0_i32_0 = arith.constant 0 : i32
    %c0_i32_1 = arith.constant 0 : i32
    return %c0_i32, %c0_i32_0 : i32, i32
  }
  func.func @transform_4(%arg0: i32) -> (i32, i32) {
    %c0_i32 = arith.constant 0 : i32
    %c0_i32_0 = arith.constant 0 : i32
    %c0_i32_1 = arith.constant 0 : i32
    return %c0_i32, %c0_i32_0 : i32, i32
  }
  func.func @transform_5(%arg0: i32) -> (i32, i32) {
    %c0_i32 = arith.constant 0 : i32
    %c0_i32_0 = arith.constant 0 : i32
    %c0_i32_1 = arith.constant 0 : i32
    return %c0_i32, %c0_i32_0 : i32, i32
  }
  func.func @transform_6(%arg0: i32) -> (i32, i32) {
    %c0_i32 = arith.constant 0 : i32
    %c0_i32_0 = arith.constant 0 : i32
    %c0_i32_1 = arith.constant 0 : i32
    return %c0_i32, %c0_i32_0 : i32, i32
  }
  func.func @transform_7(%arg0: i32) -> (i32, i32) {
    %c0_i32 = arith.constant 0 : i32
    %c0_i32_0 = arith.constant 0 : i32
    return %arg0, %c0_i32 : i32, i32
  }
}

</mosaic_0001>

<bundles_post_ra>
// kernel: tpu_custom_call.1
= control target key start
LH: loop header
LB: loop body
LE: loop exit
PB: predicated region body
PF: predicated region fallthrough
CT: control target
= control target key end

     0   :  { %12 = vsyncpa [#allocation3], 0  ;;  %s3224_s0 = inlined_call_operand.vmem [shape: f32[1000,32], index: 0, kind: input, shape index: {}]   ;;  %s3225_s1 = inlined_call_operand.vmem [shape: bf16[32,256], index: 1, kind: input, shape index: {}]   ;;  %s3226_s2 = inlined_call_operand.vmem [shape: f32[1,256], index: 2, kind: input, shape index: {}]   ;;  %s3227_s3 = inlined_call_operand.vmem [shape: bf16[256,256], index: 3, kind: input, shape index: {}]   ;;  %s3228_s4 = inlined_call_operand.vmem [shape: f32[1,256], index: 4, kind: input, shape index: {}]   ;;  %s3229_s5 = inlined_call_operand.vmem [shape: bf16[256,128], index: 5, kind: input, shape index: {}]   ;;  %s3230_s6 = inlined_call_operand.vmem [shape: f32[1,128], index: 6, kind: input, shape index: {}]   ;;  %s3231_s7 = inlined_call_operand.hbm [shape: f32[1000,128], index: 7, kind: output, shape index: {}]  }
   0x1   :  { %14 = vsyncpa [#allocation3 + $0x1], 0  ;;  %s2379_s24 = smov 0   ;;  %s2381_s25 = smov 0  }
   0x2   :  { %s2383_s26 = smov 0   ;;  %s2385_s27 = smov 0  }
   0x3 LB: > { %s2400_s28 = sadd.s32 4294967295, %s2334_s27   ;;  %s1911_s29 = sadd.s32 4294967294, %s2334_s27   ;;  %s2334_s27 = sphi %s2385_s27, %s3240_s27   ;;  %s2330_s26 = sphi %s2383_s26, %s3239_s26   ;;  %s2326_s25 = sphi %s2381_s25, %s3238_s25   ;;  %s2322_s24 = sphi %s2379_s24, %s3237_s24  }
   0x4   : > { %s2404_s30 = sadd.s32 1, %s2334_s27   ;;  %s179_s8 = sadd.s32 1, %s2330_s26 }
   0x5   : > { %s176_s9 = ssub.s32 %s2334_s27, %s2404_s30  ;;  %p189_p0 = scmp.ne.s32.totalorder %s2330_s26, %s2326_s25 }
   0x6   : > { %p177_p1 = scmp.eq.s32.totalorder %s176_s9, 0  ;;  %p190_p2 = scmp.eq.s32.totalorder %s2400_s28, 3 }
   0x7   : > { %p195_p3 = scmp.ne.s32.totalorder %s2326_s25, %s2322_s24  ;;  %p196_p4 = scmp.eq.s32.totalorder %s1911_s29, 3 }
   0x8   : > { %s2415_s10 = scalar_select %p177_p1, %s2330_s26, %s179_s8  }
   0x9   : > { %p2417_p5 = por %p190_p2, %p189_p0  ;;  %p2421_p6 = por %p196_p4, %p195_p3 }
   0xa   : > { %p1914_p7 = scmp.ge.s32.totalorder %s2334_s27, 1  ;;  %p249_p8 = scmp.lt.s32.totalorder %s2334_s27, 5 }
   0xc   : > { %p250_p9 = pnand %p1914_p7, %p249_p8 }
   0xd   : > { %s2452_s15 = sshll.u32 (!%p250_p9), %s2400_s28, 5  ;;  %s282_s9 = sand.u32 (!%p250_p9), 1, %s2326_s25  }
   0xe   : > { %253 = sbr.rel (%p250_p9) target bundleno = 844 (0x34c), region = 48  ;;  %p290_p10 = scmp.lt.s32.totalorder (!%p250_p9), %s2452_s15, 124 }
   0xf   : > { %s1915_s17 = sshll.u32 (!%p250_p9), %s282_s9, 8  ;;  %s3163_s19 = scalar_lea.sflag (!%p250_p9), [#allocation3], %s282_s9 }
  0x10   : > { %s3077_s18 = scalar_lea.vmem (!%p250_p9), [#allocation2], %s1915_s17 }
  0x13   : > { %v1928_v0 = vld [vmem:[%s3225_s1 + $0x10] sm:$0xf]  ;;  %v2170_v1 = vld [vmem:[%s3225_s1 + $0x14] sm:$0xf0]  ;;  %v2169_v2 = vld [vmem:[%s3225_s1 + $0x14] sm:$0xf] }
  0x14   : > { %v1929_v3 = vor.u32 %v2170_v1, %v1928_v0  ;;  %v1930_v4 = vld [vmem:[%s3225_s1 + $0x18] sm:$0xf0]  ;;  %v1920_v5 = vld [vmem:[%s3225_s1] sm:$0xf]  ;;  %v2168_v6 = vld [vmem:[%s3225_s1 + $0x4] sm:$0xf0] }
  0x15   : > { %v1933_v7 = vor.u32 %v2169_v2, %v1930_v4  ;;  %v2167_v8 = vld [vmem:[%s3225_s1 + $0x4] sm:$0xf]  ;;  %v1922_v9 = vld [vmem:[%s3225_s1 + $0x8] sm:$0xf0]  ;;  %v1921_v10 = vor.u32 %v2168_v6, %v1920_v5  ;;  %v2185_v11 = vld [vmem:[%s3227_s3 + $0x74] sm:$0xf] }
  0x16   : > { %438 = vmatpush.bf16.msra.mxu0 %v1929_v3  ;;  %v2026_v12 = vld [vmem:[%s3227_s3 + $0x78] sm:$0xf0]  ;;  %v1925_v13 = vor.u32 %v2167_v8, %v1922_v9  ;;  %v2201_v15 = vld [vmem:[%s3227_s3 + $0xf4] sm:$0xf]  ;;  %s291_s29 = scalar_select %p290_p10, %s2452_s15, 124  ;;  %vm383_vm0 = vcmask 261120  }
  0x17   : > { %527 = vmatpush.bf16.msra.mxu1 %v1933_v7  ;;  %v2029_v14 = vor.u32 %v2185_v11, %v2026_v12  ;;  %v2090_v16 = vld [vmem:[%s3227_s3 + $0xf8] sm:$0xf0]  ;;  %v2183_v21 = vld [vmem:[%s3227_s3 + $0x64] sm:$0xf]  ;;  %v2018_v22 = vld [vmem:[%s3227_s3 + $0x68] sm:$0xf0] }
  0x18   : > { %v2093_v17 = vor.u32 %v2201_v15, %v2090_v16  ;;  %s1917_s8 = sshll.u32 %s291_s29, 3  ;;  %v2199_v23 = vld [vmem:[%s3227_s3 + $0xe4] sm:$0xf]  ;;  %v2021_v24 = vor.u32 %v2183_v21, %v2018_v22  ;;  %v2082_v25 = vld [vmem:[%s3227_s3 + $0xe8] sm:$0xf0]  ;;  %s1835_s20 = ssub.s32 (%p2417_p5), 125, %s2452_s15 }
  0x19   : > { %s2471_s14 = scalar_lea.vmem %s3224_s0, %s1917_s8  ;;  %v2085_v26 = vor.u32 %v2199_v23, %v2082_v25  ;;  %v2181_v33 = vld [vmem:[%s3227_s3 + $0x54] sm:$0xf]  ;;  %v2010_v34 = vld [vmem:[%s3227_s3 + $0x58] sm:$0xf0]  ;;  %v2179_v45 = vld [vmem:[%s3227_s3 + $0x44] sm:$0xf] }
  0x1a   : > { %439 = vmatpush.bf16.msra.mxu0 %v1921_v10  ;;  %v305_v18 = vld [vmem:[%s2471_s14] sm:$0xff]  ;;  %v306_v19 = vld [vmem:[%s2471_s14 + $0x8] sm:$0xff]  ;;  %v307_v27 = vld [vmem:[%s2471_s14 + $0x10] sm:$0xff]  ;;  %v2013_v36 = vor.u32 %v2181_v33, %v2010_v34  ;;  %p1836_p11 = scmp.lt.s32.totalorder (%p2417_p5), %s1835_s20, 32 }
  0x1b   : > { %528 = vmatpush.bf16.msra.mxu1 %v1925_v13  ;;  %v337_v20 = vpack.c.bf16 %v306_v19, %v305_v18  ;;  %v308_v28 = vld [vmem:[%s2471_s14 + $0x18] sm:$0xff]  ;;  %v309_v30 = vld [vmem:[%s2471_s14 + $0x20] sm:$0xff]  ;;  %v310_v31 = vld [vmem:[%s2471_s14 + $0x28] sm:$0xff] }
  0x1c   : > { %v338_v29 = vpack.c.bf16 %v308_v28, %v307_v27  ;;  %v339_v32 = vpack.c.bf16 %v310_v31, %v309_v30  ;;  %v2197_v35 = vld [vmem:[%s3227_s3 + $0xd4] sm:$0xf]  ;;  %v2074_v37 = vld [vmem:[%s3227_s3 + $0xd8] sm:$0xf0]  ;;  %v313_v42 = vld [vmem:[%s2471_s14 + $0x40] sm:$0xff] }
  0x1d   : > { %1934 = vmatmul.msk.bf16.vlgmr.msra.gmra.mxu0 %vm383_vm0, %v337_v20  ;;  %v2077_v38 = vor.u32 %v2197_v35, %v2074_v37  ;;  %v311_v39 = vld [vmem:[%s2471_s14 + $0x30] sm:$0xff]  ;;  %v312_v40 = vld [vmem:[%s2471_s14 + $0x38] sm:$0xff]  ;;  %v314_v43 = vld [vmem:[%s2471_s14 + $0x48] sm:$0xff] }
  0x1e   : > { %1146 = vmatpush.bf16.msrb.mxu0 %v2029_v14  ;;  %1950 = vmatmul.msk.bf16.vlgmr.msra.gmra.mxu1 %vm383_vm0, %v337_v20  ;;  %v340_v41 = vpack.c.bf16 %v312_v40, %v311_v39  ;;  %v341_v44 = vpack.c.bf16 %v314_v43, %v313_v42  ;;  %v2002_v46 = vld [vmem:[%s3227_s3 + $0x48] sm:$0xf0]  ;;  %v2195_v47 = vld [vmem:[%s3227_s3 + $0xc4] sm:$0xf]  ;;  %v2024_v50 = vld [vmem:[%s3227_s3 + $0x70] sm:$0xf] }
  0x1f   : > { %1235 = vmatpush.bf16.msrb.mxu1 %v2093_v17  ;;  %v2005_v48 = vor.u32 %v2179_v45, %v2002_v46  ;;  %v2066_v49 = vld [vmem:[%s3227_s3 + $0xc8] sm:$0xf0]  ;;  %v2186_v51 = vld [vmem:[%s3227_s3 + $0x74] sm:$0xf0]  ;;  %v2088_v54 = vld [vmem:[%s3227_s3 + $0xf0] sm:$0xf] }
  0x20   : > { %v2069_v52 = vor.u32 %v2195_v47, %v2066_v49  ;;  %v2025_v53 = vor.u32 %v2186_v51, %v2024_v50  ;;  %v2202_v55 = vld [vmem:[%s3227_s3 + $0xf4] sm:$0xf0]  ;;  %v315_v57 = vld [vmem:[%s2471_s14 + $0x50] sm:$0xff]  ;;  %v2016_v60 = vld [vmem:[%s3227_s3 + $0x60] sm:$0xf] }
  0x21   : > { %v2089_v56 = vor.u32 %v2202_v55, %v2088_v54  ;;  %v316_v58 = vld [vmem:[%s2471_s14 + $0x58] sm:$0xff]  ;;  %v2184_v61 = vld [vmem:[%s3227_s3 + $0x64] sm:$0xf0]  ;;  %v2080_v62 = vld [vmem:[%s3227_s3 + $0xe0] sm:$0xf] }
  0x22   : > { %1147 = vmatpush.bf16.msrb.mxu0 %v2021_v24  ;;  %968 = vmatpush.bf16.msra.mxu2 %v2025_v53  ;;  %v342_v59 = vpack.c.bf16 %v316_v58, %v315_v57  ;;  %v2017_v63 = vor.u32 %v2184_v61, %v2016_v60  ;;  %v2200_v0 = vld [vmem:[%s3227_s3 + $0xe4] sm:$0xf0]  ;;  %v2008_v1 = vld [vmem:[%s3227_s3 + $0x50] sm:$0xf]  ;;  %v2182_v2 = vld [vmem:[%s3227_s3 + $0x54] sm:$0xf0] }
  0x23   : > { %1236 = vmatpush.bf16.msrb.mxu1 %v2085_v26  ;;  %1057 = vmatpush.bf16.msra.mxu3 %v2089_v56  ;;  %v2081_v3 = vor.u32 %v2200_v0, %v2080_v62  ;;  %v2072_v4 = vld [vmem:[%s3227_s3 + $0xd0] sm:$0xf]  ;;  %v2198_v5 = vld [vmem:[%s3227_s3 + $0xd4] sm:$0xf0]  ;;  %v2009_v6 = vor.u32 %v2182_v2, %v2008_v1  ;;  %v2000_v8 = vld [vmem:[%s3227_s3 + $0x40] sm:$0xf] }
  0x24   : > { %v2073_v7 = vor.u32 %v2198_v5, %v2072_v4  ;;  %v2180_v9 = vld [vmem:[%s3227_s3 + $0x44] sm:$0xf0]  ;;  %v2064_v10 = vld [vmem:[%s3227_s3 + $0xc0] sm:$0xf]  ;;  %v1992_v17 = vld [vmem:[%s3227_s3 + $0x30] sm:$0xf] }
  0x25   : > { %v2196_v11 = vld [vmem:[%s3227_s3 + $0xc4] sm:$0xf0]  ;;  %v2001_v12 = vor.u32 %v2180_v9, %v2000_v8  ;;  %v317_v14 = vld [vmem:[%s2471_s14 + $0x60] sm:$0xff]  ;;  %v2178_v18 = vld [vmem:[%s3227_s3 + $0x34] sm:$0xf0] }
  0x26   : > { %1148 = vmatpush.bf16.msrb.mxu0 %v2013_v36  ;;  %969 = vmatpush.bf16.msra.mxu2 %v2017_v63  ;;  %v2065_v13 = vor.u32 %v2196_v11, %v2064_v10  ;;  %v318_v15 = vld [vmem:[%s2471_s14 + $0x68] sm:$0xff]  ;;  %v1993_v19 = vor.u32 %v2178_v18, %v1992_v17  ;;  %v2056_v20 = vld [vmem:[%s3227_s3 + $0xb0] sm:$0xf]  ;;  %v2194_v21 = vld [vmem:[%s3227_s3 + $0xb4] sm:$0xf0] }
  0x27   : > { %1237 = vmatpush.bf16.msrb.mxu1 %v2077_v38  ;;  %1058 = vmatpush.bf16.msra.mxu3 %v2081_v3  ;;  %v343_v16 = vpack.c.bf16 %v318_v15, %v317_v14  ;;  %v2057_v22 = vor.u32 %v2194_v21, %v2056_v20  ;;  %v1984_v23 = vld [vmem:[%s3227_s3 + $0x20] sm:$0xf]  ;;  %v2176_v24 = vld [vmem:[%s3227_s3 + $0x24] sm:$0xf0]  ;;  %v2177_v28 = vld [vmem:[%s3227_s3 + $0x34] sm:$0xf] }
  0x28   : > { %v2048_v25 = vld [vmem:[%s3227_s3 + $0xa0] sm:$0xf]  ;;  %v1985_v26 = vor.u32 %v2176_v24, %v1984_v23  ;;  %v2192_v27 = vld [vmem:[%s3227_s3 + $0xa4] sm:$0xf0]  ;;  %v2193_v30 = vld [vmem:[%s3227_s3 + $0xb4] sm:$0xf] }
  0x29   : > { %v2049_v31 = vor.u32 %v2192_v27, %v2048_v25  ;;  %v2058_v33 = vld [vmem:[%s3227_s3 + $0xb8] sm:$0xf0]  ;;  %v1976_v35 = vld [vmem:[%s3227_s3 + $0x10] sm:$0xf]  ;;  %v2174_v36 = vld [vmem:[%s3227_s3 + $0x14] sm:$0xf0] }
  0x2a   : > { %1149 = vmatpush.bf16.msrb.mxu0 %v2005_v48  ;;  %970 = vmatpush.bf16.msra.mxu2 %v2009_v6  ;;  %v2061_v34 = vor.u32 %v2193_v30, %v2058_v33  ;;  %v2040_v37 = vld [vmem:[%s3227_s3 + $0x90] sm:$0xf]  ;;  %v1977_v38 = vor.u32 %v2174_v36, %v1976_v35  ;;  %v2190_v39 = vld [vmem:[%s3227_s3 + $0x94] sm:$0xf0]  ;;  %v2172_v42 = vld [vmem:[%s3227_s3 + $0x4] sm:$0xf0] }
  0x2b   : > { %1238 = vmatpush.bf16.msrb.mxu1 %v2069_v52  ;;  %1059 = vmatpush.bf16.msra.mxu3 %v2073_v7  ;;  %v2041_v40 = vor.u32 %v2190_v39, %v2040_v37  ;;  %v2032_v43 = vld [vmem:[%s3227_s3 + $0x80] sm:$0xf]  ;;  %v320_v45 = vld [vmem:[%s2471_s14 + $0x78] sm:$0xff]  ;;  %v2188_v47 = vld [vmem:[%s3227_s3 + $0x84] sm:$0xf0] }
  0x2c   : > { %v2033_v48 = vor.u32 %v2188_v47, %v2032_v43  ;;  %v2210_v50 = vld [vmem:[%s3229_s5 + $0x38] sm:$0xff]  ;;  %v321_v52 = vld [vmem:[%s2471_s14 + $0x80] sm:$0xff]  ;;  %v322_v53 = vld [vmem:[%s2471_s14 + $0x88] sm:$0xff] }
  0x2d   : > { %1935 = vmatmul.msk.bf16.gmra.mxu0 %vm383_vm0, %v338_v29  ;;  %v2218_v51 = vld [vmem:[%s3229_s5 + $0x78] sm:$0xff]  ;;  %v357_v54 = vld [vmem:[%s3226_s2] sm:$0x3]  ;;  %v345_v55 = vpack.c.bf16 %v322_v53, %v321_v52  ;;  %v2175_v62 = vld [vmem:[%s3227_s3 + $0x24] sm:$0xf] }
  0x2e   : > { %1951 = vmatmul.msk.bf16.gmra.mxu1 %vm383_vm0, %v338_v29  ;;  %971 = vmatpush.bf16.msra.mxu2 %v2001_v12  ;;  %v1994_v29 = vld [vmem:[%s3227_s3 + $0x38] sm:$0xf0]  ;;  %v2660_v58 = vperm.slane %v357_v54, 0  ;;  %v1986_v63 = vld [vmem:[%s3227_s3 + $0x28] sm:$0xf0]  ;;  %v323_v12 = vld [vmem:[%s2471_s14 + $0x90] sm:$0xff] }
  0x2f   : > { %1060 = vmatpush.bf16.msra.mxu3 %v2065_v13  ;;  %1239 = vmatpush.bf16.msrb.mxu1 %v2061_v34  ;;  %v2191_v0 = vld [vmem:[%s3227_s3 + $0xa4] sm:$0xf]  ;;  %v1989_v1 = vor.u32 %v2175_v62, %v1986_v63  ;;  %v2050_v2 = vld [vmem:[%s3227_s3 + $0xa8] sm:$0xf0]  ;;  %v324_v13 = vld [vmem:[%s2471_s14 + $0x98] sm:$0xff] }
  0x30   : > { %v2053_v3 = vor.u32 %v2191_v0, %v2050_v2  ;;  %v346_v20 = vpack.c.bf16 %v324_v13, %v323_v12  ;;  %v2209_v25 = vld [vmem:[%s3229_s5 + $0x30] sm:$0xff]  ;;  %v325_v35 = vld [vmem:[%s2471_s14 + $0xa0] sm:$0xff]  ;;  %v326_v36 = vld [vmem:[%s2471_s14 + $0xa8] sm:$0xff] }
  0x31   : > { %v347_v43 = vpack.c.bf16 %v326_v36, %v325_v35  ;;  %v2042_v52 = vld [vmem:[%s3227_s3 + $0x98] sm:$0xf0]  ;;  %v327_v0 = vld [vmem:[%s2471_s14 + $0xb0] sm:$0xff]  ;;  %v2208_v13 = vld [vmem:[%s3229_s5 + $0x28] sm:$0xff] }
  0x32   : > { %972 = vmatpush.bf16.msra.mxu2 %v1993_v19 }
  0x33   : > { %1061 = vmatpush.bf16.msra.mxu3 %v2057_v22  ;;  %1240 = vmatpush.bf16.msrb.mxu1 %v2053_v3 }
  0x36   : > { %973 = vmatpush.bf16.msra.mxu2 %v1985_v26  ;;  %v2217_v26 = vld [vmem:[%s3229_s5 + $0x70] sm:$0xff] }
  0x37   : > { %1062 = vmatpush.bf16.msra.mxu3 %v2049_v31 }
  0x3a   : > { %974 = vmatpush.bf16.msra.mxu2 %v1977_v38 }
  0x3b   : > { %1063 = vmatpush.bf16.msra.mxu3 %v2041_v40 }
  0x3d   : > { %1936 = vmatmul.msk.bf16.gmra.mxu0 %vm383_vm0, %v339_v32 }
  0x3e   : > { %1952 = vmatmul.msk.bf16.gmra.mxu1 %vm383_vm0, %v339_v32  ;;  %v1997_v32 = vor.u32 %v2177_v28, %v1994_v29 }
  0x3f   : > { %1064 = vmatpush.bf16.msra.mxu3 %v2033_v48  ;;  %v2173_v48 = vld [vmem:[%s3227_s3 + $0x14] sm:$0xf] }
  0x40   : > { %1150 = vmatpush.bf16.msrb.mxu0 %v1997_v32 }
  0x43   : > { %1705 = vmatpush.bf16.msrb.mxu3 %v2218_v51 }
  0x44   : > { %1151 = vmatpush.bf16.msrb.mxu0 %v1989_v1  ;;  %v328_v1 = vld [vmem:[%s2471_s14 + $0xb8] sm:$0xff] }
  0x47   : > { %1706 = vmatpush.bf16.msrb.mxu3 %v2217_v26  ;;  %v330_v26 = vld [vmem:[%s2471_s14 + $0xc8] sm:$0xff] }
  0x4d   : > { %1937 = vmatmul.msk.bf16.gmra.mxu0 %vm383_vm0, %v340_v41 }
  0x4e   : > { %1953 = vmatmul.msk.bf16.gmra.mxu1 %vm383_vm0, %v340_v41  ;;  %v1968_v41 = vld [vmem:[%s3227_s3] sm:$0xf] }
  0x4f   : > { %v1969_v46 = vor.u32 %v2172_v42, %v1968_v41 }
  0x51   : > { %975 = vmatpush.bf16.msra.mxu2 %v1969_v46 }
  0x55   : > { %1616 = vmatpush.bf16.msrb.mxu2 %v2210_v50  ;;  %v2189_v50 = vld [vmem:[%s3227_s3 + $0x94] sm:$0xf] }
  0x56   : > { %v2045_v53 = vor.u32 %v2189_v50, %v2042_v52 }
  0x58   : > { %1241 = vmatpush.bf16.msrb.mxu1 %v2045_v53 }
  0x59   : > { %1617 = vmatpush.bf16.msrb.mxu2 %v2209_v25  ;;  %v329_v25 = vld [vmem:[%s2471_s14 + $0xc0] sm:$0xff] }
  0x5d   : > { %1938 = vmatmul.msk.bf16.gmra.mxu0 %vm383_vm0, %v341_v44  ;;  %1618 = vmatpush.bf16.msrb.mxu2 %v2208_v13 }
  0x5e   : > { %1954 = vmatmul.msk.bf16.gmra.mxu1 %vm383_vm0, %v341_v44  ;;  %v319_v44 = vld [vmem:[%s2471_s14 + $0x70] sm:$0xff] }
  0x5f   : > { %v344_v49 = vpack.c.bf16 %v320_v45, %v319_v44 }
  0x6d   : > { %1939 = vmatmul.msk.bf16.gmra.mxu0 %vm383_vm0, %v342_v59 }
  0x6e   : > { %1955 = vmatmul.msk.bf16.gmra.mxu1 %vm383_vm0, %v342_v59  ;;  %v2662_v59 = vperm.slane %v357_v54, 1 }
  0x7d   : > { %1940 = vmatmul.msk.bf16.gmra.mxu0 %vm383_vm0, %v343_v16 }
  0x7e   : > { %1956 = vmatmul.msk.bf16.gmra.mxu1 %vm383_vm0, %v343_v16 }
  0x8d   : > { %1941 = vmatmul.msk.bf16.gmra.mxu0 %vm383_vm0, %v344_v49 }
  0x8e   : > { %1957 = vmatmul.msk.bf16.gmra.mxu1 %vm383_vm0, %v344_v49  ;;  %v1978_v49 = vld [vmem:[%s3227_s3 + $0x18] sm:$0xf0] }
  0x8f   : > { %v1981_v51 = vor.u32 %v2173_v48, %v1978_v49 }
  0x91   : > { %1152 = vmatpush.bf16.msrb.mxu0 %v1981_v51 }
  0x9a   : > { %v441_v56 = vpop.f32.mrf.mxu0 }
  0x9b   : > { %v530_v57 = vpop.f32.mrf.mxu1  ;;  %v442_v60 = vadd.f32 %v441_v56, %v2660_v58 }
  0x9c   : > { %v531_v61 = vadd.f32 %v530_v57, %v2662_v59 }
  0x9d   : > { %1942 = vmatmul.msk.bf16.gmra.mxu0 %vm383_vm0, %v345_v55  ;;  %v610_v6 = vmul.f32 0.01, %v442_v60 }
  0x9e   : > { %1958 = vmatmul.msk.bf16.gmra.mxu1 %vm383_vm0, %v345_v55  ;;  %v611_v7 = vmul.f32 0.01, %v531_v61 }
  0x9f   : > { %v674_v14 = vmax.f32 %v442_v60, %v610_v6 }
  0xa0   : > { %v675_v15 = vmax.f32 %v531_v61, %v611_v7 }
  0xa2   : > { %v443_v4 = vpop.f32.mrf.mxu0 }
  0xa3   : > { %v532_v5 = vpop.f32.mrf.mxu1  ;;  %v444_v8 = vadd.f32 %v443_v4, %v2660_v58 }
  0xa4   : > { %v533_v9 = vadd.f32 %v532_v5, %v2662_v59 }
  0xa5   : > { %v612_v10 = vmul.f32 0.01, %v444_v8 }
  0xa6   : > { %v613_v11 = vmul.f32 0.01, %v533_v9 }
  0xa7   : > { %v676_v16 = vmax.f32 %v444_v8, %v612_v10  ;;  %v348_v8 = vpack.c.bf16 %v328_v1, %v327_v0 }
  0xa8   : > { %v677_v17 = vmax.f32 %v533_v9, %v613_v11 }
  0xa9   : > { %v2684_v18 = vpack.c.bf16 %v676_v16, %v674_v14  ;;  %v2216_v14 = vld [vmem:[%s3229_s5 + $0x68] sm:$0xff] }
  0xaa   : > { %v2686_v19 = vpack.c.bf16 %v677_v17, %v675_v15  ;;  %v446_v21 = vpop.f32.mrf.mxu0  ;;  %1707 = vmatpush.bf16.msrb.mxu3 %v2216_v14 }
  0xab   : > { %v535_v22 = vpop.f32.mrf.mxu1  ;;  %976 = vmatmul.bf16.vlgmr.msra.gmra.mxu2 %v2684_v18  ;;  %v447_v23 = vadd.f32 %v446_v21, %v2660_v58 }
  0xac   : > { %1065 = vmatmul.bf16.vlgmr.msra.gmra.mxu3 %v2686_v19  ;;  %v536_v24 = vadd.f32 %v535_v22, %v2662_v59 }
  0xad   : > { %1943 = vmatmul.msk.bf16.gmra.mxu0 %vm383_vm0, %v346_v20  ;;  %v614_v29 = vmul.f32 0.01, %v447_v23 }
  0xae   : > { %1959 = vmatmul.msk.bf16.gmra.mxu1 %vm383_vm0, %v346_v20  ;;  %v615_v30 = vmul.f32 0.01, %v536_v24 }
  0xaf   : > { %v678_v37 = vmax.f32 %v447_v23, %v614_v29 }
  0xb0   : > { %v679_v38 = vmax.f32 %v536_v24, %v615_v30 }
  0xb2   : > { %v448_v27 = vpop.f32.mrf.mxu0 }
  0xb3   : > { %v537_v28 = vpop.f32.mrf.mxu1  ;;  %v449_v31 = vadd.f32 %v448_v27, %v2660_v58 }
  0xb4   : > { %v538_v32 = vadd.f32 %v537_v28, %v2662_v59 }
  0xb5   : > { %v616_v33 = vmul.f32 0.01, %v449_v31 }
  0xb6   : > { %v617_v34 = vmul.f32 0.01, %v538_v32 }
  0xb7   : > { %v680_v39 = vmax.f32 %v449_v31, %v616_v33  ;;  %v349_v33 = vpack.c.bf16 %v330_v26, %v329_v25 }
  0xb8   : > { %v681_v40 = vmax.f32 %v538_v32, %v617_v34 }
  0xb9   : > { %v2704_v41 = vpack.c.bf16 %v680_v39, %v678_v37  ;;  %v1970_v39 = vld [vmem:[%s3227_s3 + $0x8] sm:$0xf0] }
  0xba   : > { %v2706_v42 = vpack.c.bf16 %v681_v40, %v679_v38  ;;  %v451_v44 = vpop.f32.mrf.mxu0  ;;  %v2171_v38 = vld [vmem:[%s3227_s3 + $0x4] sm:$0xf] }
  0xbb   : > { %v540_v45 = vpop.f32.mrf.mxu1  ;;  %981 = vmatmul.bf16.gmra.mxu2 %v2704_v41  ;;  %v452_v46 = vadd.f32 %v451_v44, %v2660_v58  ;;  %v2187_v40 = vld [vmem:[%s3227_s3 + $0x84] sm:$0xf]  ;;  %v2034_v44 = vld [vmem:[%s3227_s3 + $0x88] sm:$0xf0] }
  0xbc   : > { %1070 = vmatmul.bf16.gmra.mxu3 %v2706_v42  ;;  %v541_v47 = vadd.f32 %v540_v45, %v2662_v59  ;;  %v2037_v45 = vor.u32 %v2187_v40, %v2034_v44  ;;  %v335_v44 = vld [vmem:[%s2471_s14 + $0xf0] sm:$0xff] }
  0xbd   : > { %1944 = vmatmul.msk.bf16.gmra.mxu0 %vm383_vm0, %v347_v43  ;;  %v618_v56 = vmul.f32 0.01, %v452_v46 }
  0xbe   : > { %1960 = vmatmul.msk.bf16.gmra.mxu1 %vm383_vm0, %v347_v43  ;;  %v619_v57 = vmul.f32 0.01, %v541_v47  ;;  %v1973_v43 = vor.u32 %v2171_v38, %v1970_v39 }
  0xbf   : > { %v682_v2 = vmax.f32 %v452_v46, %v618_v56  ;;  %1242 = vmatpush.bf16.msrb.mxu1 %v2037_v45  ;;  %v336_v45 = vld [vmem:[%s2471_s14 + $0xf8] sm:$0xff] }
  0xc0   : > { %v683_v3 = vmax.f32 %v541_v47, %v619_v57  ;;  %1153 = vmatpush.bf16.msrb.mxu0 %v1973_v43 }
  0xc2   : > { %v453_v54 = vpop.f32.mrf.mxu0 }
  0xc3   : > { %v542_v55 = vpop.f32.mrf.mxu1  ;;  %v454_v60 = vadd.f32 %v453_v54, %v2660_v58  ;;  %v331_v54 = vld [vmem:[%s2471_s14 + $0xd0] sm:$0xff] }
  0xc4   : > { %v543_v61 = vadd.f32 %v542_v55, %v2662_v59  ;;  %v332_v55 = vld [vmem:[%s2471_s14 + $0xd8] sm:$0xff] }
  0xc5   : > { %v620_v62 = vmul.f32 0.01, %v454_v60  ;;  %v350_v0 = vpack.c.bf16 %v332_v55, %v331_v54 }
  0xc6   : > { %v621_v63 = vmul.f32 0.01, %v543_v61 }
  0xc7   : > { %v684_v4 = vmax.f32 %v454_v60, %v620_v62 }
  0xc8   : > { %v685_v5 = vmax.f32 %v543_v61, %v621_v63 }
  0xc9   : > { %v2730_v6 = vpack.c.bf16 %v684_v4, %v682_v2 }
  0xca   : > { %v2732_v7 = vpack.c.bf16 %v685_v5, %v683_v3  ;;  %v456_v9 = vpop.f32.mrf.mxu0  ;;  %v2207_v5 = vld [vmem:[%s3229_s5 + $0x20] sm:$0xff] }
  0xcb   : > { %v545_v10 = vpop.f32.mrf.mxu1  ;;  %986 = vmatmul.bf16.gmra.mxu2 %v2730_v6  ;;  %v457_v11 = vadd.f32 %v456_v9, %v2660_v58 }
  0xcc   : > { %1075 = vmatmul.bf16.gmra.mxu3 %v2732_v7  ;;  %v546_v12 = vadd.f32 %v545_v10, %v2662_v59  ;;  %1619 = vmatpush.bf16.msrb.mxu2 %v2207_v5 }
  0xcd   : > { %1945 = vmatmul.msk.bf16.gmra.mxu0 %vm383_vm0, %v348_v8  ;;  %v622_v17 = vmul.f32 0.01, %v457_v11 }
  0xce   : > { %1961 = vmatmul.msk.bf16.gmra.mxu1 %vm383_vm0, %v348_v8  ;;  %v623_v20 = vmul.f32 0.01, %v546_v12  ;;  %v2215_v8 = vld [vmem:[%s3229_s5 + $0x60] sm:$0xff] }
  0xcf   : > { %v686_v27 = vmax.f32 %v457_v11, %v622_v17  ;;  %1708 = vmatpush.bf16.msrb.mxu3 %v2215_v8  ;;  %v333_v17 = vld [vmem:[%s2471_s14 + $0xe0] sm:$0xff] }
  0xd0   : > { %v687_v28 = vmax.f32 %v546_v12, %v623_v20  ;;  %v334_v20 = vld [vmem:[%s2471_s14 + $0xe8] sm:$0xff] }
  0xd2   : > { %v458_v15 = vpop.f32.mrf.mxu0 }
  0xd3   : > { %v547_v16 = vpop.f32.mrf.mxu1  ;;  %v459_v21 = vadd.f32 %v458_v15, %v2660_v58 }
  0xd4   : > { %v548_v22 = vadd.f32 %v547_v16, %v2662_v59 }
  0xd5   : > { %v624_v23 = vmul.f32 0.01, %v459_v21 }
  0xd6   : > { %v625_v24 = vmul.f32 0.01, %v548_v22 }
  0xd7   : > { %v688_v29 = vmax.f32 %v459_v21, %v624_v23 }
  0xd8   : > { %v689_v30 = vmax.f32 %v548_v22, %v625_v24 }
  0xd9   : > { %v2750_v31 = vpack.c.bf16 %v688_v29, %v686_v27  ;;  %v351_v27 = vpack.c.bf16 %v334_v20, %v333_v17 }
  0xda   : > { %v2752_v32 = vpack.c.bf16 %v689_v30, %v687_v28  ;;  %v461_v34 = vpop.f32.mrf.mxu0 }
  0xdb   : > { %v550_v35 = vpop.f32.mrf.mxu1  ;;  %991 = vmatmul.bf16.gmra.mxu2 %v2750_v31  ;;  %v462_v36 = vadd.f32 %v461_v34, %v2660_v58 }
  0xdc   : > { %1080 = vmatmul.bf16.gmra.mxu3 %v2752_v32  ;;  %v551_v37 = vadd.f32 %v550_v35, %v2662_v59 }
  0xdd   : > { %1946 = vmatmul.msk.bf16.gmra.mxu0 %vm383_vm0, %v349_v33  ;;  %v626_v48 = vmul.f32 0.01, %v462_v36 }
  0xde   : > { %1962 = vmatmul.msk.bf16.gmra.mxu1 %vm383_vm0, %v349_v33  ;;  %v627_v49 = vmul.f32 0.01, %v551_v37 }
  0xdf   : > { %v690_v56 = vmax.f32 %v462_v36, %v626_v48 }
  0xe0   : > { %v691_v57 = vmax.f32 %v551_v37, %v627_v49 }
  0xe2   : > { %v463_v46 = vpop.f32.mrf.mxu0 }
  0xe3   : > { %v552_v47 = vpop.f32.mrf.mxu1  ;;  %v464_v50 = vadd.f32 %v463_v46, %v2660_v58 }
  0xe4   : > { %v553_v51 = vadd.f32 %v552_v47, %v2662_v59 }
  0xe5   : > { %v628_v52 = vmul.f32 0.01, %v464_v50 }
  0xe6   : > { %v629_v53 = vmul.f32 0.01, %v553_v51 }
  0xe7   : > { %v692_v60 = vmax.f32 %v464_v50, %v628_v52  ;;  %v352_v52 = vpack.c.bf16 %v336_v45, %v335_v44 }
  0xe8   : > { %v693_v61 = vmax.f32 %v553_v51, %v629_v53 }
  0xe9   : > { %v2776_v62 = vpack.c.bf16 %v692_v60, %v690_v56  ;;  %v2214_v60 = vld [vmem:[%s3229_s5 + $0x58] sm:$0xff] }
  0xea   : > { %v2778_v63 = vpack.c.bf16 %v693_v61, %v691_v57  ;;  %v466_v1 = vpop.f32.mrf.mxu0  ;;  %v2206_v57 = vld [vmem:[%s3229_s5 + $0x18] sm:$0xff]  ;;  %1709 = vmatpush.bf16.msrb.mxu3 %v2214_v60 }
  0xeb   : > { %v555_v2 = vpop.f32.mrf.mxu1  ;;  %996 = vmatmul.bf16.gmra.mxu2 %v2776_v62  ;;  %v467_v3 = vadd.f32 %v466_v1, %v2660_v58 }
  0xec   : > { %1085 = vmatmul.bf16.gmra.mxu3 %v2778_v63  ;;  %v556_v4 = vadd.f32 %v555_v2, %v2662_v59  ;;  %1620 = vmatpush.bf16.msrb.mxu2 %v2206_v57 }
  0xed   : > { %1947 = vmatmul.msk.bf16.gmra.mxu0 %vm383_vm0, %v350_v0  ;;  %v630_v11 = vmul.f32 0.01, %v467_v3 }
  0xee   : > { %1963 = vmatmul.msk.bf16.gmra.mxu1 %vm383_vm0, %v350_v0  ;;  %v631_v12 = vmul.f32 0.01, %v556_v4 }
  0xef   : > { %v694_v21 = vmax.f32 %v467_v3, %v630_v11 }
  0xf0   : > { %v695_v22 = vmax.f32 %v556_v4, %v631_v12 }
  0xf2   : > { %v468_v9 = vpop.f32.mrf.mxu0 }
  0xf3   : > { %v557_v10 = vpop.f32.mrf.mxu1  ;;  %v469_v13 = vadd.f32 %v468_v9, %v2660_v58 }
  0xf4   : > { %v558_v14 = vadd.f32 %v557_v10, %v2662_v59 }
  0xf5   : > { %v632_v15 = vmul.f32 0.01, %v469_v13 }
  0xf6   : > { %v633_v16 = vmul.f32 0.01, %v558_v14 }
  0xf7   : > { %v696_v23 = vmax.f32 %v469_v13, %v632_v15 }
  0xf8   : > { %v697_v24 = vmax.f32 %v558_v14, %v633_v16 }
  0xf9   : > { %v2796_v25 = vpack.c.bf16 %v696_v23, %v694_v21 }
  0xfa   : > { %v2798_v26 = vpack.c.bf16 %v697_v24, %v695_v22  ;;  %v471_v28 = vpop.f32.mrf.mxu0 }
  0xfb   : > { %v560_v29 = vpop.f32.mrf.mxu1  ;;  %1001 = vmatmul.bf16.gmra.mxu2 %v2796_v25  ;;  %v472_v30 = vadd.f32 %v471_v28, %v2660_v58 }
  0xfc   : > { %1090 = vmatmul.bf16.gmra.mxu3 %v2798_v26  ;;  %v561_v33 = vadd.f32 %v560_v29, %v2662_v59 }
  0xfd   : > { %1948 = vmatmul.msk.bf16.gmra.mxu0 %vm383_vm0, %v351_v27  ;;  %v634_v36 = vmul.f32 0.01, %v472_v30 }
  0xfe   : > { %1964 = vmatmul.msk.bf16.gmra.mxu1 %vm383_vm0, %v351_v27  ;;  %v635_v37 = vmul.f32 0.01, %v561_v33 }
  0xff   : > { %v698_v46 = vmax.f32 %v472_v30, %v634_v36 }
 0x100   : > { %v699_v47 = vmax.f32 %v561_v33, %v635_v37 }
 0x102   : > { %v473_v34 = vpop.f32.mrf.mxu0 }
 0x103   : > { %v562_v35 = vpop.f32.mrf.mxu1  ;;  %v474_v38 = vadd.f32 %v473_v34, %v2660_v58 }
 0x104   : > { %v563_v39 = vadd.f32 %v562_v35, %v2662_v59 }
 0x105   : > { %v636_v40 = vmul.f32 0.01, %v474_v38 }
 0x106   : > { %v637_v43 = vmul.f32 0.01, %v563_v39 }
 0x107   : > { %v700_v48 = vmax.f32 %v474_v38, %v636_v40 }
 0x108   : > { %v701_v49 = vmax.f32 %v563_v39, %v637_v43 }
 0x109   : > { %v2810_v50 = vpack.c.bf16 %v700_v48, %v698_v46  ;;  %v2205_v48 = vld [vmem:[%s3229_s5 + $0x10] sm:$0xff] }
 0x10a   : > { %v2812_v51 = vpack.c.bf16 %v701_v49, %v699_v47  ;;  %v476_v53 = vpop.f32.mrf.mxu0  ;;  %v2213_v49 = vld [vmem:[%s3229_s5 + $0x50] sm:$0xff]  ;;  %1621 = vmatpush.bf16.msrb.mxu2 %v2205_v48 }
 0x10b   : > { %v565_v54 = vpop.f32.mrf.mxu1  ;;  %1006 = vmatmul.bf16.gmra.mxu2 %v2810_v50  ;;  %v477_v55 = vadd.f32 %v476_v53, %v2660_v58  ;;  %1710 = vmatpush.bf16.msrb.mxu3 %v2213_v49 }
 0x10c   : > { %1095 = vmatmul.bf16.gmra.mxu3 %v2812_v51  ;;  %v566_v56 = vadd.f32 %v565_v54, %v2662_v59 }
 0x10d   : > { %1949 = vmatmul.msk.bf16.gmra.mxu0 %vm383_vm0, %v352_v52  ;;  %v638_v1 = vmul.f32 0.01, %v477_v55 }
 0x10e   : > { %1965 = vmatmul.msk.bf16.gmra.mxu1 %vm383_vm0, %v352_v52  ;;  %v639_v2 = vmul.f32 0.01, %v566_v56 }
 0x10f   : > { %v702_v9 = vmax.f32 %v477_v55, %v638_v1 }
 0x110   : > { %v703_v10 = vmax.f32 %v566_v56, %v639_v2 }
 0x112   : > { %v478_v61 = vpop.f32.mrf.mxu0 }
 0x113   : > { %v567_v0 = vpop.f32.mrf.mxu1  ;;  %v479_v3 = vadd.f32 %v478_v61, %v2660_v58 }
 0x114   : > { %v568_v4 = vadd.f32 %v567_v0, %v2662_v59 }
 0x115   : > { %v640_v5 = vmul.f32 0.01, %v479_v3 }
 0x116   : > { %v641_v8 = vmul.f32 0.01, %v568_v4 }
 0x117   : > { %v704_v11 = vmax.f32 %v479_v3, %v640_v5 }
 0x118   : > { %v705_v12 = vmax.f32 %v568_v4, %v641_v8 }
 0x119   : > { %v2828_v13 = vpack.c.bf16 %v704_v11, %v702_v9 }
 0x11a   : > { %v2830_v14 = vpack.c.bf16 %v705_v12, %v703_v10  ;;  %v481_v15 = vpop.f32.mrf.mxu0 }
 0x11b   : > { %v570_v16 = vpop.f32.mrf.mxu1  ;;  %1011 = vmatmul.bf16.gmra.mxu2 %v2828_v13  ;;  %v482_v17 = vadd.f32 %v481_v15, %v2660_v58 }
 0x11c   : > { %1100 = vmatmul.bf16.gmra.mxu3 %v2830_v14  ;;  %v571_v20 = vadd.f32 %v570_v16, %v2662_v59 }
 0x11d   : > { %1154 = vmatmul.bf16.vlgmr.msrb.gmra.mxu0 %v2684_v18  ;;  %v642_v23 = vmul.f32 0.01, %v482_v17 }
 0x11e   : > { %1243 = vmatmul.bf16.vlgmr.msrb.gmra.mxu1 %v2686_v19  ;;  %v643_v24 = vmul.f32 0.01, %v571_v20  ;;  %v2843_v19 = vld [vmem:[%s3228_s4] sm:$0x3] }
 0x11f   : > { %v706_v33 = vmax.f32 %v482_v17, %v642_v23  ;;  %v2852_v40 = vperm.slane %v2843_v19, 0 }
 0x120   : > { %v707_v34 = vmax.f32 %v571_v20, %v643_v24 }
 0x122   : > { %v483_v21 = vpop.f32.mrf.mxu0 }
 0x123   : > { %v572_v22 = vpop.f32.mrf.mxu1  ;;  %v484_v27 = vadd.f32 %v483_v21, %v2660_v58 }
 0x124   : > { %v573_v28 = vadd.f32 %v572_v22, %v2662_v59 }
 0x125   : > { %v644_v29 = vmul.f32 0.01, %v484_v27 }
 0x126   : > { %v645_v30 = vmul.f32 0.01, %v573_v28 }
 0x127   : > { %v708_v35 = vmax.f32 %v484_v27, %v644_v29 }
 0x128   : > { %v709_v18 = vmax.f32 %v573_v28, %v645_v30 }
 0x129   : > { %v2845_v36 = vpack.c.bf16 %v708_v35, %v706_v33 }
 0x12a   : > { %v2847_v37 = vpack.c.bf16 %v709_v18, %v707_v34  ;;  %v486_v38 = vpop.f32.mrf.mxu0 }
 0x12b   : > { %v575_v39 = vpop.f32.mrf.mxu1  ;;  %1016 = vmatmul.bf16.gmra.mxu2 %v2845_v36  ;;  %v487_v43 = vadd.f32 %v486_v38, %v2660_v58 }
 0x12c   : > { %1105 = vmatmul.bf16.gmra.mxu3 %v2847_v37  ;;  %v576_v46 = vadd.f32 %v575_v39, %v2662_v59 }
 0x12d   : > { %1159 = vmatmul.bf16.gmra.mxu0 %v2704_v41  ;;  %v646_v41 = vmul.f32 0.01, %v487_v43 }
 0x12e   : > { %1248 = vmatmul.bf16.gmra.mxu1 %v2706_v42  ;;  %v977_v44 = vpop.f32.mrf.mxu2  ;;  %v647_v54 = vmul.f32 0.01, %v576_v46 }
 0x12f   : > { %v1066_v45 = vpop.f32.mrf.mxu3  ;;  %v978_v47 = vadd.f32 %v977_v44, %v2852_v40  ;;  %v710_v61 = vmax.f32 %v487_v43, %v646_v41 }
 0x130   : > { %v711_v2 = vmax.f32 %v576_v46, %v647_v54 }
 0x131   : > { %v1067_v52 = vadd.f32 %v1066_v45, %v978_v47 }
 0x132   : > { %v488_v42 = vpop.f32.mrf.mxu0 }
 0x133   : > { %v577_v53 = vpop.f32.mrf.mxu1  ;;  %v489_v55 = vadd.f32 %v488_v42, %v2660_v58  ;;  %v1324_v8 = vmul.f32 0.01, %v1067_v52 }
 0x134   : > { %v578_v56 = vadd.f32 %v577_v53, %v2662_v59 }
 0x135   : > { %v648_v57 = vmul.f32 0.01, %v489_v55  ;;  %v1388_v17 = vmax.f32 %v1067_v52, %v1324_v8 }
 0x136   : > { %v649_v60 = vmul.f32 0.01, %v578_v56  ;;  %v979_v0 = vpop.f32.mrf.mxu2 }
 0x137   : > { %v1068_v1 = vpop.f32.mrf.mxu3  ;;  %v980_v3 = vadd.f32 %v979_v0, %v2852_v40  ;;  %v712_v4 = vmax.f32 %v489_v55, %v648_v57 }
 0x138   : > { %v713_v5 = vmax.f32 %v578_v56, %v649_v60 }
 0x139   : > { %v1069_v9 = vadd.f32 %v1068_v1, %v980_v3  ;;  %v2868_v10 = vpack.c.bf16 %v712_v4, %v710_v61  ;;  %v2204_v3 = vld [vmem:[%s3229_s5 + $0x8] sm:$0xff] }
 0x13a   : > { %v2870_v11 = vpack.c.bf16 %v713_v5, %v711_v2  ;;  %v491_v12 = vpop.f32.mrf.mxu0  ;;  %v2212_v4 = vld [vmem:[%s3229_s5 + $0x48] sm:$0xff]  ;;  %1622 = vmatpush.bf16.msrb.mxu2 %v2204_v3 }
 0x13b   : > { %v580_v15 = vpop.f32.mrf.mxu1  ;;  %v1326_v16 = vmul.f32 0.01, %v1069_v9  ;;  %1021 = vmatmul.bf16.gmra.mxu2 %v2868_v10  ;;  %v492_v21 = vadd.f32 %v491_v12, %v2660_v58  ;;  %1711 = vmatpush.bf16.msrb.mxu3 %v2212_v4 }
 0x13c   : > { %1110 = vmatmul.bf16.gmra.mxu3 %v2870_v11  ;;  %v581_v27 = vadd.f32 %v580_v15, %v2662_v59 }
 0x13d   : > { %v1390_v20 = vmax.f32 %v1069_v9, %v1326_v16  ;;  %1164 = vmatmul.bf16.gmra.mxu0 %v2730_v6  ;;  %v650_v30 = vmul.f32 0.01, %v492_v21 }
 0x13e   : > { %1253 = vmatmul.bf16.gmra.mxu1 %v2732_v7  ;;  %v982_v22 = vpop.f32.mrf.mxu2  ;;  %v651_v35 = vmul.f32 0.01, %v581_v27 }
 0x13f   : > { %v1071_v23 = vpop.f32.mrf.mxu3  ;;  %v2877_v24 = vpack.c.bf16 %v1390_v20, %v1388_v17  ;;  %v983_v28 = vadd.f32 %v982_v22, %v2852_v40  ;;  %v714_v39 = vmax.f32 %v492_v21, %v650_v30 }
 0x140   : > { %v715_v45 = vmax.f32 %v581_v27, %v651_v35 }
 0x141   : > { %v1072_v29 = vadd.f32 %v1071_v23, %v983_v28 }
 0x142   : > { %v493_v33 = vpop.f32.mrf.mxu0 }
 0x143   : > { %v582_v34 = vpop.f32.mrf.mxu1  ;;  %v494_v18 = vadd.f32 %v493_v33, %v2660_v58  ;;  %v1328_v49 = vmul.f32 0.01, %v1072_v29 }
 0x144   : > { %v583_v6 = vadd.f32 %v582_v34, %v2662_v59 }
 0x145   : > { %v652_v7 = vmul.f32 0.01, %v494_v18  ;;  %v1392_v56 = vmax.f32 %v1072_v29, %v1328_v49 }
 0x146   : > { %v653_v38 = vmul.f32 0.01, %v583_v6  ;;  %v984_v43 = vpop.f32.mrf.mxu2 }
 0x147   : > { %v1073_v44 = vpop.f32.mrf.mxu3  ;;  %v985_v46 = vadd.f32 %v984_v43, %v2852_v40  ;;  %v716_v47 = vmax.f32 %v494_v18, %v652_v7 }
 0x148   : > { %v717_v48 = vmax.f32 %v583_v6, %v653_v38 }
 0x149   : > { %v1074_v52 = vadd.f32 %v1073_v44, %v985_v46  ;;  %v2884_v41 = vpack.c.bf16 %v716_v47, %v714_v39 }
 0x14a   : > { %v2886_v42 = vpack.c.bf16 %v717_v48, %v715_v45  ;;  %v496_v53 = vpop.f32.mrf.mxu0 }
 0x14b   : > { %v585_v54 = vpop.f32.mrf.mxu1  ;;  %v1330_v55 = vmul.f32 0.01, %v1074_v52  ;;  %1026 = vmatmul.bf16.gmra.mxu2 %v2884_v41  ;;  %v497_v60 = vadd.f32 %v496_v53, %v2660_v58 }
 0x14c   : > { %1115 = vmatmul.bf16.gmra.mxu3 %v2886_v42  ;;  %v586_v1 = vadd.f32 %v585_v54, %v2662_v59 }
 0x14d   : > { %v1394_v57 = vmax.f32 %v1074_v52, %v1330_v55  ;;  %1169 = vmatmul.bf16.gmra.mxu0 %v2750_v31 }
 0x14e   : > { %1258 = vmatmul.bf16.gmra.mxu1 %v2752_v32  ;;  %v987_v61 = vpop.f32.mrf.mxu2  ;;  %v654_v32 = vmul.f32 0.01, %v497_v60  ;;  %v655_v12 = vmul.f32 0.01, %v586_v1 }
 0x14f   : > { %v1076_v0 = vpop.f32.mrf.mxu3  ;;  %v988_v2 = vadd.f32 %v987_v61, %v2852_v40  ;;  %v2901_v5 = vpack.c.bf16 %v1394_v57, %v1392_v56 }
 0x150   : > { %v718_v21 = vmax.f32 %v497_v60, %v654_v32  ;;  %v719_v27 = vmax.f32 %v586_v1, %v655_v12 }
 0x151   : > { %v1077_v31 = vadd.f32 %v1076_v0, %v988_v2 }
 0x152   : > { %v498_v8 = vpop.f32.mrf.mxu0 }
 0x153   : > { %v587_v9 = vpop.f32.mrf.mxu1  ;;  %v499_v15 = vadd.f32 %v498_v8, %v2660_v58  ;;  %v1332_v33 = vmul.f32 0.01, %v1077_v31 }
 0x154   : > { %v588_v16 = vadd.f32 %v587_v9, %v2662_v59 }
 0x155   : > { %v656_v17 = vmul.f32 0.01, %v499_v15  ;;  %v1396_v39 = vmax.f32 %v1077_v31, %v1332_v33  ;;  %v2211_v33 = vld [vmem:[%s3229_s5 + $0x40] sm:$0xff] }
 0x156   : > { %v657_v20 = vmul.f32 0.01, %v588_v16  ;;  %v989_v22 = vpop.f32.mrf.mxu2  ;;  %1712 = vmatpush.bf16.msrb.mxu3 %v2211_v33 }
 0x157   : > { %v1078_v23 = vpop.f32.mrf.mxu3  ;;  %v990_v28 = vadd.f32 %v989_v22, %v2852_v40  ;;  %v720_v29 = vmax.f32 %v499_v15, %v656_v17 }
 0x158   : > { %v721_v30 = vmax.f32 %v588_v16, %v657_v20 }
 0x159   : > { %v1079_v34 = vadd.f32 %v1078_v23, %v990_v28  ;;  %v2906_v35 = vpack.c.bf16 %v720_v29, %v718_v21 }
 0x15a   : > { %v2908_v18 = vpack.c.bf16 %v721_v30, %v719_v27  ;;  %v501_v6 = vpop.f32.mrf.mxu0  ;;  %v2203_v30 = vld [vmem:[%s3229_s5] sm:$0xff] }
 0x15b   : > { %v590_v7 = vpop.f32.mrf.mxu1  ;;  %v1334_v38 = vmul.f32 0.01, %v1079_v34  ;;  %1031 = vmatmul.bf16.gmra.mxu2 %v2906_v35  ;;  %v502_v44 = vadd.f32 %v501_v6, %v2660_v58 }
 0x15c   : > { %1120 = vmatmul.bf16.gmra.mxu3 %v2908_v18  ;;  %v591_v47 = vadd.f32 %v590_v7, %v2662_v59  ;;  %1623 = vmatpush.bf16.msrb.mxu2 %v2203_v30 }
 0x15d   : > { %v1398_v43 = vmax.f32 %v1079_v34, %v1334_v38  ;;  %1174 = vmatmul.bf16.gmra.mxu0 %v2776_v62  ;;  %v658_v53 = vmul.f32 0.01, %v502_v44 }
 0x15e   : > { %1263 = vmatmul.bf16.gmra.mxu1 %v2778_v63  ;;  %v992_v45 = vpop.f32.mrf.mxu2  ;;  %v659_v56 = vmul.f32 0.01, %v591_v47 }
 0x15f   : > { %v1081_v46 = vpop.f32.mrf.mxu3  ;;  %v993_v48 = vadd.f32 %v992_v45, %v2852_v40  ;;  %v2917_v49 = vpack.c.bf16 %v1398_v43, %v1396_v39  ;;  %v722_v61 = vmax.f32 %v502_v44, %v658_v53 }
 0x160   : > { %v723_v2 = vmax.f32 %v591_v47, %v659_v56 }
 0x161   : > { %v1082_v52 = vadd.f32 %v1081_v46, %v993_v48 }
 0x162   : > { %v503_v54 = vpop.f32.mrf.mxu0 }
 0x163   : > { %v592_v55 = vpop.f32.mrf.mxu1  ;;  %v504_v57 = vadd.f32 %v503_v54, %v2660_v58  ;;  %v1336_v32 = vmul.f32 0.01, %v1082_v52 }
 0x164   : > { %v593_v62 = vadd.f32 %v592_v55, %v2662_v59 }
 0x165   : > { %v660_v63 = vmul.f32 0.01, %v504_v57  ;;  %v1400_v20 = vmax.f32 %v1082_v52, %v1336_v32 }
 0x166   : > { %v661_v60 = vmul.f32 0.01, %v593_v62  ;;  %v994_v0 = vpop.f32.mrf.mxu2 }
 0x167   : > { %v1083_v1 = vpop.f32.mrf.mxu3  ;;  %v724_v3 = vmax.f32 %v504_v57, %v660_v63  ;;  %v995_v31 = vadd.f32 %v994_v0, %v2852_v40 }
 0x168   : > { %v725_v4 = vmax.f32 %v593_v62, %v661_v60 }
 0x169   : > { %v1084_v8 = vadd.f32 %v1083_v1, %v995_v31  ;;  %v2922_v9 = vpack.c.bf16 %v724_v3, %v722_v61 }
 0x16a   : > { %v2924_v12 = vpack.c.bf16 %v725_v4, %v723_v2  ;;  %v506_v15 = vpop.f32.mrf.mxu0 }
 0x16b   : > { %v595_v16 = vpop.f32.mrf.mxu1  ;;  %v1338_v17 = vmul.f32 0.01, %v1084_v8  ;;  %1036 = vmatmul.bf16.gmra.mxu2 %v2922_v9  ;;  %v507_v22 = vadd.f32 %v506_v15, %v2660_v58 }
 0x16c   : > { %1125 = vmatmul.bf16.gmra.mxu3 %v2924_v12  ;;  %v596_v28 = vadd.f32 %v595_v16, %v2662_v59 }
 0x16d   : > { %v1402_v21 = vmax.f32 %v1084_v8, %v1338_v17  ;;  %1179 = vmatmul.bf16.gmra.mxu0 %v2796_v25 }
 0x16e   : > { %1268 = vmatmul.bf16.gmra.mxu1 %v2798_v26  ;;  %v997_v23 = vpop.f32.mrf.mxu2  ;;  %v662_v26 = vmul.f32 0.01, %v507_v22  ;;  %v663_v38 = vmul.f32 0.01, %v596_v28 }
 0x16f   : > { %v1086_v27 = vpop.f32.mrf.mxu3  ;;  %v998_v29 = vadd.f32 %v997_v23, %v2852_v40  ;;  %v2939_v34 = vpack.c.bf16 %v1402_v21, %v1400_v20 }
 0x170   : > { %v726_v46 = vmax.f32 %v507_v22, %v662_v26  ;;  %v727_v52 = vmax.f32 %v596_v28, %v663_v38 }
 0x171   : > { %v1087_v25 = vadd.f32 %v1086_v27, %v998_v29 }
 0x172   : > { %v508_v6 = vpop.f32.mrf.mxu0 }
 0x173   : > { %v597_v7 = vpop.f32.mrf.mxu1  ;;  %v509_v39 = vadd.f32 %v508_v6, %v2660_v58  ;;  %v1340_v56 = vmul.f32 0.01, %v1087_v25 }
 0x174   : > { %v598_v43 = vadd.f32 %v597_v7, %v2662_v59 }
 0x175   : > { %v664_v44 = vmul.f32 0.01, %v509_v39  ;;  %v1404_v1 = vmax.f32 %v1087_v25, %v1340_v56 }
 0x176   : > { %v665_v45 = vmul.f32 0.01, %v598_v43  ;;  %v999_v47 = vpop.f32.mrf.mxu2 }
 0x177   : > { %v1088_v48 = vpop.f32.mrf.mxu3  ;;  %v728_v53 = vmax.f32 %v509_v39, %v664_v44  ;;  %v1000_v55 = vadd.f32 %v999_v47, %v2852_v40 }
 0x178   : > { %v729_v54 = vmax.f32 %v598_v43, %v665_v45 }
 0x179   : > { %v1089_v57 = vadd.f32 %v1088_v48, %v1000_v55  ;;  %v2944_v62 = vpack.c.bf16 %v728_v53, %v726_v46 }
 0x17a   : > { %v2946_v63 = vpack.c.bf16 %v729_v54, %v727_v52  ;;  %v511_v60 = vpop.f32.mrf.mxu0 }
 0x17b   : > { %v600_v61 = vpop.f32.mrf.mxu1  ;;  %v1342_v0 = vmul.f32 0.01, %v1089_v57  ;;  %1041 = vmatmul.bf16.gmra.mxu2 %v2944_v62  ;;  %v512_v3 = vadd.f32 %v511_v60, %v2660_v58 }
 0x17c   : > { %1130 = vmatmul.bf16.gmra.mxu3 %v2946_v63  ;;  %v601_v32 = vadd.f32 %v600_v61, %v2662_v59 }
 0x17d   : > { %v1406_v2 = vmax.f32 %v1089_v57, %v1342_v0  ;;  %1184 = vmatmul.bf16.gmra.mxu0 %v2810_v50  ;;  %v666_v17 = vmul.f32 0.01, %v512_v3 }
 0x17e   : > { %1273 = vmatmul.bf16.gmra.mxu1 %v2812_v51  ;;  %v1002_v4 = vpop.f32.mrf.mxu2  ;;  %v667_v22 = vmul.f32 0.01, %v601_v32 }
 0x17f   : > { %v1091_v31 = vpop.f32.mrf.mxu3  ;;  %v1003_v8 = vadd.f32 %v1002_v4, %v2852_v40  ;;  %v2955_v15 = vpack.c.bf16 %v1406_v2, %v1404_v1  ;;  %v730_v28 = vmax.f32 %v512_v3, %v666_v17 }
 0x180   : > { %v731_v33 = vmax.f32 %v601_v32, %v667_v22  ;;  %v2977_v22 = vperm.slane %v2843_v19, 1 }
 0x181   : > { %v1092_v16 = vadd.f32 %v1091_v31, %v1003_v8 }
 0x182   : > { %v513_v20 = vpop.f32.mrf.mxu0 }
 0x183   : > { %v602_v21 = vpop.f32.mrf.mxu1  ;;  %v514_v23 = vadd.f32 %v513_v20, %v2660_v58  ;;  %v1344_v7 = vmul.f32 0.01, %v1092_v16 }
 0x184   : > { %v603_v50 = vadd.f32 %v602_v21, %v2662_v59 }
 0x185   : > { %v668_v51 = vmul.f32 0.01, %v514_v23  ;;  %v1408_v47 = vmax.f32 %v1092_v16, %v1344_v7 }
 0x186   : > { %v669_v27 = vmul.f32 0.01, %v603_v50  ;;  %v1004_v29 = vpop.f32.mrf.mxu2 }
 0x187   : > { %v1093_v30 = vpop.f32.mrf.mxu3  ;;  %v732_v25 = vmax.f32 %v514_v23, %v668_v51  ;;  %v1005_v6 = vadd.f32 %v1004_v29, %v2852_v40 }
 0x188   : > { %v733_v26 = vmax.f32 %v603_v50, %v669_v27 }
 0x189   : > { %v1094_v38 = vadd.f32 %v1093_v30, %v1005_v6  ;;  %v2960_v39 = vpack.c.bf16 %v732_v25, %v730_v28 }
 0x18a   : > { %v2962_v43 = vpack.c.bf16 %v733_v26, %v731_v33  ;;  %v516_v44 = vpop.f32.mrf.mxu0 }
 0x18b   : > { %v605_v45 = vpop.f32.mrf.mxu1  ;;  %v1346_v46 = vmul.f32 0.01, %v1094_v38  ;;  %1046 = vmatmul.bf16.gmra.mxu2 %v2960_v39  ;;  %v517_v52 = vadd.f32 %v516_v44, %v2660_v58 }
 0x18c   : > { %1135 = vmatmul.bf16.gmra.mxu3 %v2962_v43  ;;  %v606_v55 = vadd.f32 %v605_v45, %v2662_v59 }
 0x18d   : > { %v1410_v48 = vmax.f32 %v1094_v38, %v1346_v46  ;;  %1189 = vmatmul.bf16.gmra.mxu0 %v2828_v13  ;;  %v670_v61 = vmul.f32 0.01, %v517_v52 }
 0x18e   : > { %1278 = vmatmul.bf16.gmra.mxu1 %v2830_v14  ;;  %v1007_v53 = vpop.f32.mrf.mxu2  ;;  %v671_v2 = vmul.f32 0.01, %v606_v55 }
 0x18f   : > { %v1096_v54 = vpop.f32.mrf.mxu3  ;;  %v1008_v56 = vadd.f32 %v1007_v53, %v2852_v40  ;;  %v2971_v57 = vpack.c.bf16 %v1410_v48, %v1408_v47  ;;  %v734_v31 = vmax.f32 %v517_v52, %v670_v61 }
 0x190   : > { %v735_v16 = vmax.f32 %v606_v55, %v671_v2 }
 0x191   : > { %v1097_v60 = vadd.f32 %v1096_v54, %v1008_v56 }
 0x192   : > { %v518_v0 = vpop.f32.mrf.mxu0 }
 0x193   : > { %v607_v1 = vpop.f32.mrf.mxu1  ;;  %v519_v3 = vadd.f32 %v518_v0, %v2660_v58  ;;  %v1348_v23 = vmul.f32 0.01, %v1097_v60 }
 0x194   : > { %v608_v13 = vadd.f32 %v607_v1, %v2662_v59 }
 0x195   : > { %v672_v14 = vmul.f32 0.01, %v519_v3  ;;  %v1412_v29 = vmax.f32 %v1097_v60, %v1348_v23 }
 0x196   : > { %v673_v4 = vmul.f32 0.01, %v608_v13  ;;  %v1009_v32 = vpop.f32.mrf.mxu2 }
 0x197   : > { %v1098_v8 = vpop.f32.mrf.mxu3  ;;  %v736_v17 = vmax.f32 %v519_v3, %v672_v14  ;;  %v1010_v21 = vadd.f32 %v1009_v32, %v2852_v40 }
 0x198   : > { %v737_v20 = vmax.f32 %v608_v13, %v673_v4 }
 0x199   : > { %v1099_v50 = vadd.f32 %v1098_v8, %v1010_v21  ;;  %v2979_v51 = vpack.c.bf16 %v736_v17, %v734_v31 }
 0x19a   : > { %v2981_v58 = vpack.c.bf16 %v737_v20, %v735_v16  ;;  %v1155_v59 = vpop.f32.mrf.mxu0 }
 0x19b   : > { %v1244_v27 = vpop.f32.mrf.mxu1  ;;  %v1350_v28 = vmul.f32 0.01, %v1099_v50  ;;  %1051 = vmatmul.bf16.gmra.mxu2 %v2979_v51  ;;  %v1156_v33 = vadd.f32 %v1155_v59, %v2977_v22 }
 0x19c   : > { %1140 = vmatmul.bf16.gmra.mxu3 %v2981_v58 }
 0x19d   : > { %v1414_v30 = vmax.f32 %v1099_v50, %v1350_v28  ;;  %1194 = vmatmul.bf16.gmra.mxu0 %v2845_v36  ;;  %v1245_v7 = vadd.f32 %v1244_v27, %v1156_v33 }
 0x19e   : > { %1283 = vmatmul.bf16.gmra.mxu1 %v2847_v37  ;;  %v1012_v19 = vpop.f32.mrf.mxu2 }
 0x19f   : > { %v1101_v25 = vpop.f32.mrf.mxu3  ;;  %v1013_v26 = vadd.f32 %v1012_v19, %v2852_v40  ;;  %v2989_v6 = vpack.c.bf16 %v1414_v30, %v1412_v29  ;;  %v1325_v47 = vmul.f32 0.01, %v1245_v7 }
 0x1a1   : > { %v1102_v38 = vadd.f32 %v1101_v25, %v1013_v26  ;;  %v1389_v37 = vmax.f32 %v1245_v7, %v1325_v47 }
 0x1a2   : > { %v1157_v44 = vpop.f32.mrf.mxu0 }
 0x1a3   : > { %v1246_v45 = vpop.f32.mrf.mxu1  ;;  %v1158_v46 = vadd.f32 %v1157_v44, %v2977_v22  ;;  %v1352_v55 = vmul.f32 0.01, %v1102_v38 }
 0x1a5   : > { %v1247_v48 = vadd.f32 %v1246_v45, %v1158_v46  ;;  %v1416_v3 = vmax.f32 %v1102_v38, %v1352_v55 }
 0x1a6   : > { %v1014_v52 = vpop.f32.mrf.mxu2 }
 0x1a7   : > { %v1103_v53 = vpop.f32.mrf.mxu3  ;;  %v1327_v54 = vmul.f32 0.01, %v1247_v48  ;;  %v1015_v36 = vadd.f32 %v1014_v52, %v2852_v40 }
 0x1a9   : > { %v1391_v56 = vmax.f32 %v1247_v48, %v1327_v54  ;;  %v1104_v60 = vadd.f32 %v1103_v53, %v1015_v36 }
 0x1aa   : > { %v1160_v61 = vpop.f32.mrf.mxu0 }
 0x1ab   : > { %v1249_v0 = vpop.f32.mrf.mxu1  ;;  %v1453_v1 = vpack.c.bf16 %v1391_v56, %v1389_v37  ;;  %v1354_v2 = vmul.f32 0.01, %v1104_v60  ;;  %1624 = vmatmul.bf16.vlgmr.msrb.gmra.mxu2 %v2877_v24  ;;  %v1161_v14 = vadd.f32 %v1160_v61, %v2977_v22 }
 0x1ad   : > { %v1418_v13 = vmax.f32 %v1104_v60, %v1354_v2  ;;  %1199 = vmatmul.bf16.gmra.mxu0 %v2868_v10  ;;  %1713 = vmatmul.bf16.vlgmr.msrb.gmra.mxu3 %v1453_v1  ;;  %v1250_v16 = vadd.f32 %v1249_v0, %v1161_v14 }
 0x1ae   : > { %1288 = vmatmul.bf16.gmra.mxu1 %v2870_v11  ;;  %v1017_v4 = vpop.f32.mrf.mxu2 }
 0x1af   : > { %v1106_v31 = vpop.f32.mrf.mxu3  ;;  %v1018_v32 = vadd.f32 %v1017_v4, %v2852_v40  ;;  %v2998_v8 = vpack.c.bf16 %v1418_v13, %v1416_v3  ;;  %v1329_v23 = vmul.f32 0.01, %v1250_v16 }
 0x1b1   : > { %v1107_v17 = vadd.f32 %v1106_v31, %v1018_v32  ;;  %v1393_v28 = vmax.f32 %v1250_v16, %v1329_v23 }
 0x1b2   : > { %v1162_v20 = vpop.f32.mrf.mxu0 }
 0x1b3   : > { %v1251_v24 = vpop.f32.mrf.mxu1  ;;  %v1163_v21 = vadd.f32 %v1162_v20, %v2977_v22  ;;  %v1356_v29 = vmul.f32 0.01, %v1107_v17 }
 0x1b5   : > { %v1252_v50 = vadd.f32 %v1251_v24, %v1163_v21  ;;  %v1420_v38 = vmax.f32 %v1107_v17, %v1356_v29 }
 0x1b6   : > { %v1019_v59 = vpop.f32.mrf.mxu2 }
 0x1b7   : > { %v1108_v10 = vpop.f32.mrf.mxu3  ;;  %v1331_v27 = vmul.f32 0.01, %v1252_v50  ;;  %v1020_v11 = vadd.f32 %v1019_v59, %v2852_v40 }
 0x1b9   : > { %v1395_v30 = vmax.f32 %v1252_v50, %v1331_v27  ;;  %v1109_v33 = vadd.f32 %v1108_v10, %v1020_v11 }
 0x1ba   : > { %v1165_v19 = vpop.f32.mrf.mxu0 }
 0x1bb   : > { %v1254_v25 = vpop.f32.mrf.mxu1  ;;  %v1358_v26 = vmul.f32 0.01, %v1109_v33  ;;  %1629 = vmatmul.bf16.gmra.mxu2 %v2901_v5  ;;  %v1455_v7 = vpack.c.bf16 %v1395_v30, %v1393_v28  ;;  %v1166_v45 = vadd.f32 %v1165_v19, %v2977_v22 }
 0x1bd   : > { %v1422_v44 = vmax.f32 %v1109_v33, %v1358_v26  ;;  %1204 = vmatmul.bf16.gmra.mxu0 %v2884_v41  ;;  %1718 = vmatmul.bf16.gmra.mxu3 %v1455_v7  ;;  %v1255_v53 = vadd.f32 %v1254_v25, %v1166_v45 }
 0x1be   : > { %1293 = vmatmul.bf16.gmra.mxu1 %v2886_v42  ;;  %v1022_v46 = vpop.f32.mrf.mxu2 }
 0x1bf   : > { %v1111_v47 = vpop.f32.mrf.mxu3  ;;  %v1023_v48 = vadd.f32 %v1022_v46, %v2852_v40  ;;  %v3008_v52 = vpack.c.bf16 %v1422_v44, %v1420_v38  ;;  %v1333_v55 = vmul.f32 0.01, %v1255_v53 }
 0x1c1   : > { %v1112_v54 = vadd.f32 %v1111_v47, %v1023_v48  ;;  %v1397_v0 = vmax.f32 %v1255_v53, %v1333_v55 }
 0x1c2   : > { %v1167_v36 = vpop.f32.mrf.mxu0 }
 0x1c3   : > { %v1256_v5 = vpop.f32.mrf.mxu1  ;;  %v1168_v37 = vadd.f32 %v1167_v36, %v2977_v22  ;;  %v1360_v1 = vmul.f32 0.01, %v1112_v54 }
 0x1c5   : > { %v1257_v56 = vadd.f32 %v1256_v5, %v1168_v37  ;;  %v1424_v32 = vmax.f32 %v1112_v54, %v1360_v1 }
 0x1c6   : > { %v1024_v60 = vpop.f32.mrf.mxu2 }
 0x1c7   : > { %v1113_v61 = vpop.f32.mrf.mxu3  ;;  %v1335_v41 = vmul.f32 0.01, %v1257_v56  ;;  %v1025_v42 = vadd.f32 %v1024_v60, %v2852_v40 }
 0x1c9   : > { %v1399_v2 = vmax.f32 %v1257_v56, %v1335_v41  ;;  %v1114_v3 = vadd.f32 %v1113_v61, %v1025_v42 }
 0x1ca   : > { %v1170_v13 = vpop.f32.mrf.mxu0 }
 0x1cb   : > { %v1259_v14 = vpop.f32.mrf.mxu1  ;;  %v1362_v4 = vmul.f32 0.01, %v1114_v3  ;;  %1634 = vmatmul.bf16.gmra.mxu2 %v2917_v49  ;;  %v1457_v31 = vpack.c.bf16 %v1399_v2, %v1397_v0  ;;  %v1171_v17 = vadd.f32 %v1170_v13, %v2977_v22 }
 0x1cd   : > { %v1426_v16 = vmax.f32 %v1114_v3, %v1362_v4  ;;  %1209 = vmatmul.bf16.gmra.mxu0 %v2906_v35  ;;  %1723 = vmatmul.bf16.gmra.mxu3 %v1457_v31  ;;  %v1260_v50 = vadd.f32 %v1259_v14, %v1171_v17 }
 0x1ce   : > { %1298 = vmatmul.bf16.gmra.mxu1 %v2908_v18  ;;  %v1027_v20 = vpop.f32.mrf.mxu2 }
 0x1cf   : > { %v1116_v24 = vpop.f32.mrf.mxu3  ;;  %v1028_v21 = vadd.f32 %v1027_v20, %v2852_v40  ;;  %v3017_v23 = vpack.c.bf16 %v1426_v16, %v1424_v32  ;;  %v1337_v11 = vmul.f32 0.01, %v1260_v50 }
 0x1d1   : > { %v1117_v59 = vadd.f32 %v1116_v24, %v1028_v21  ;;  %v1401_v33 = vmax.f32 %v1260_v50, %v1337_v11 }
 0x1d2   : > { %v1172_v10 = vpop.f32.mrf.mxu0 }
 0x1d3   : > { %v1261_v49 = vpop.f32.mrf.mxu1  ;;  %v1173_v27 = vadd.f32 %v1172_v10, %v2977_v22  ;;  %v1364_v19 = vmul.f32 0.01, %v1117_v59 }
 0x1d5   : > { %v1262_v28 = vadd.f32 %v1261_v49, %v1173_v27  ;;  %v1428_v46 = vmax.f32 %v1117_v59, %v1364_v19 }
 0x1d6   : > { %v1029_v29 = vpop.f32.mrf.mxu2 }
 0x1d7   : > { %v1118_v30 = vpop.f32.mrf.mxu3  ;;  %v1339_v35 = vmul.f32 0.01, %v1262_v28  ;;  %v1030_v18 = vadd.f32 %v1029_v29, %v2852_v40 }
 0x1d9   : > { %v1403_v25 = vmax.f32 %v1262_v28, %v1339_v35  ;;  %v1119_v26 = vadd.f32 %v1118_v30, %v1030_v18 }
 0x1da   : > { %v1175_v7 = vpop.f32.mrf.mxu0 }
 0x1db   : > { %v1264_v38 = vpop.f32.mrf.mxu1  ;;  %v1366_v44 = vmul.f32 0.01, %v1119_v26  ;;  %1639 = vmatmul.bf16.gmra.mxu2 %v2939_v34  ;;  %v1459_v45 = vpack.c.bf16 %v1403_v25, %v1401_v33  ;;  %v1176_v48 = vadd.f32 %v1175_v7, %v2977_v22 }
 0x1dd   : > { %v1430_v47 = vmax.f32 %v1119_v26, %v1366_v44  ;;  %1214 = vmatmul.bf16.gmra.mxu0 %v2922_v9  ;;  %1728 = vmatmul.bf16.gmra.mxu3 %v1459_v45  ;;  %v1265_v37 = vadd.f32 %v1264_v38, %v1176_v48 }
 0x1de   : > { %1303 = vmatmul.bf16.gmra.mxu1 %v2924_v12  ;;  %v1032_v53 = vpop.f32.mrf.mxu2 }
 0x1df   : > { %v1121_v54 = vpop.f32.mrf.mxu3  ;;  %v1033_v36 = vadd.f32 %v1032_v53, %v2852_v40  ;;  %v3026_v5 = vpack.c.bf16 %v1430_v47, %v1428_v46  ;;  %v1341_v61 = vmul.f32 0.01, %v1265_v37 }
 0x1e1   : > { %v1122_v55 = vadd.f32 %v1121_v54, %v1033_v36  ;;  %v1405_v1 = vmax.f32 %v1265_v37, %v1341_v61 }
 0x1e2   : > { %v1177_v56 = vpop.f32.mrf.mxu0 }
 0x1e3   : > { %v1266_v34 = vpop.f32.mrf.mxu1  ;;  %v1178_v60 = vadd.f32 %v1177_v56, %v2977_v22  ;;  %v1368_v2 = vmul.f32 0.01, %v1122_v55 }
 0x1e5   : > { %v1267_v41 = vadd.f32 %v1266_v34, %v1178_v60  ;;  %v1432_v16 = vmax.f32 %v1122_v55, %v1368_v2 }
 0x1e6   : > { %v1034_v42 = vpop.f32.mrf.mxu2 }
 0x1e7   : > { %v1123_v0 = vpop.f32.mrf.mxu3  ;;  %v1343_v9 = vmul.f32 0.01, %v1267_v41  ;;  %v1035_v12 = vadd.f32 %v1034_v42, %v2852_v40 }
 0x1e9   : > { %v1407_v3 = vmax.f32 %v1267_v41, %v1343_v9  ;;  %v1124_v13 = vadd.f32 %v1123_v0, %v1035_v12 }
 0x1ea   : > { %v1180_v14 = vpop.f32.mrf.mxu0 }
 0x1eb   : > { %v1269_v4 = vpop.f32.mrf.mxu1  ;;  %v1370_v31 = vmul.f32 0.01, %v1124_v13  ;;  %1644 = vmatmul.bf16.gmra.mxu2 %v2955_v15  ;;  %v1461_v32 = vpack.c.bf16 %v1407_v3, %v1405_v1  ;;  %v1181_v20 = vadd.f32 %v1180_v14, %v2977_v22 }
 0x1ed   : > { %v1434_v17 = vmax.f32 %v1124_v13, %v1370_v31  ;;  %1219 = vmatmul.bf16.gmra.mxu0 %v2944_v62  ;;  %1733 = vmatmul.bf16.gmra.mxu3 %v1461_v32  ;;  %v1270_v10 = vadd.f32 %v1269_v4, %v1181_v20 }
 0x1ee   : > { %1308 = vmatmul.bf16.gmra.mxu1 %v2946_v63  ;;  %v1037_v24 = vpop.f32.mrf.mxu2 }
 0x1ef   : > { %v1126_v21 = vpop.f32.mrf.mxu3  ;;  %v1038_v50 = vadd.f32 %v1037_v24, %v2852_v40  ;;  %v3035_v59 = vpack.c.bf16 %v1434_v17, %v1432_v16  ;;  %v1345_v28 = vmul.f32 0.01, %v1270_v10 }
 0x1f1   : > { %v1127_v49 = vadd.f32 %v1126_v21, %v1038_v50  ;;  %v1409_v18 = vmax.f32 %v1270_v10, %v1345_v28 }
 0x1f2   : > { %v1182_v27 = vpop.f32.mrf.mxu0 }
 0x1f3   : > { %v1271_v15 = vpop.f32.mrf.mxu1  ;;  %v1183_v11 = vadd.f32 %v1182_v27, %v2977_v22  ;;  %v1372_v33 = vmul.f32 0.01, %v1127_v49 }
 0x1f5   : > { %v1272_v29 = vadd.f32 %v1271_v15, %v1183_v11  ;;  %v1436_v45 = vmax.f32 %v1127_v49, %v1372_v33 }
 0x1f6   : > { %v1039_v30 = vpop.f32.mrf.mxu2 }
 0x1f7   : > { %v1128_v35 = vpop.f32.mrf.mxu3  ;;  %v1347_v62 = vmul.f32 0.01, %v1272_v29  ;;  %v1040_v63 = vadd.f32 %v1039_v30, %v2852_v40 }
 0x1f9   : > { %v1411_v19 = vmax.f32 %v1272_v29, %v1347_v62  ;;  %v1129_v25 = vadd.f32 %v1128_v35, %v1040_v63 }
 0x1fa   : > { %v1185_v26 = vpop.f32.mrf.mxu0 }
 0x1fb   : > { %v1274_v7 = vpop.f32.mrf.mxu1  ;;  %v1374_v38 = vmul.f32 0.01, %v1129_v25  ;;  %1649 = vmatmul.bf16.gmra.mxu2 %v2971_v57  ;;  %v1463_v44 = vpack.c.bf16 %v1411_v19, %v1409_v18  ;;  %v1186_v47 = vadd.f32 %v1185_v26, %v2977_v22 }
 0x1fd   : > { %v1438_v46 = vmax.f32 %v1129_v25, %v1374_v38  ;;  %1224 = vmatmul.bf16.gmra.mxu0 %v2960_v39  ;;  %1738 = vmatmul.bf16.gmra.mxu3 %v1463_v44  ;;  %v1275_v37 = vadd.f32 %v1274_v7, %v1186_v47 }
 0x1fe   : > { %1313 = vmatmul.bf16.gmra.mxu1 %v2962_v43  ;;  %v1042_v48 = vpop.f32.mrf.mxu2 }
 0x1ff   : > { %v1131_v53 = vpop.f32.mrf.mxu3  ;;  %v1043_v54 = vadd.f32 %v1042_v48, %v2852_v40  ;;  %v3044_v36 = vpack.c.bf16 %v1438_v46, %v1436_v45  ;;  %v1349_v60 = vmul.f32 0.01, %v1275_v37 }
 0x201   : > { %v1132_v55 = vadd.f32 %v1131_v53, %v1043_v54  ;;  %v1413_v0 = vmax.f32 %v1275_v37, %v1349_v60 }
 0x202   : > { %v1187_v56 = vpop.f32.mrf.mxu0 }
 0x203   : > { %v1276_v57 = vpop.f32.mrf.mxu1  ;;  %v1188_v34 = vadd.f32 %v1187_v56, %v2977_v22  ;;  %v1376_v9 = vmul.f32 0.01, %v1132_v55 }
 0x205   : > { %v1277_v61 = vadd.f32 %v1276_v57, %v1188_v34  ;;  %v1440_v4 = vmax.f32 %v1132_v55, %v1376_v9 }
 0x206   : > { %v1044_v41 = vpop.f32.mrf.mxu2 }
 0x207   : > { %v1133_v42 = vpop.f32.mrf.mxu3  ;;  %v1351_v39 = vmul.f32 0.01, %v1277_v61  ;;  %v1045_v43 = vadd.f32 %v1044_v41, %v2852_v40 }
 0x209   : > { %v1415_v12 = vmax.f32 %v1277_v61, %v1351_v39  ;;  %v1134_v1 = vadd.f32 %v1133_v42, %v1045_v43 }
 0x20a   : > { %v1190_v2 = vpop.f32.mrf.mxu0 }
 0x20b   : > { %v1279_v3 = vpop.f32.mrf.mxu1  ;;  %v1378_v13 = vmul.f32 0.01, %v1134_v1  ;;  %1654 = vmatmul.bf16.gmra.mxu2 %v2989_v6  ;;  %v1465_v14 = vpack.c.bf16 %v1415_v12, %v1413_v0  ;;  %v1191_v32 = vadd.f32 %v1190_v2, %v2977_v22 }
 0x20d   : > { %v1442_v31 = vmax.f32 %v1134_v1, %v1378_v13  ;;  %1229 = vmatmul.bf16.gmra.mxu0 %v2979_v51  ;;  %1743 = vmatmul.bf16.gmra.mxu3 %v1465_v14  ;;  %v1280_v21 = vadd.f32 %v1279_v3, %v1191_v32  ;;  %v3068_v1 = vld [vmem:[%s3230_s6] ss:$0 sm:$0xff] }
 0x20e   : > { %1318 = vmatmul.bf16.gmra.mxu1 %v2981_v58  ;;  %v1047_v16 = vpop.f32.mrf.mxu2 }
 0x20f   : > { %v1136_v17 = vpop.f32.mrf.mxu3  ;;  %v1048_v20 = vadd.f32 %v1047_v16, %v2852_v40  ;;  %v3053_v24 = vpack.c.bf16 %v1442_v31, %v1440_v4  ;;  %v1353_v27 = vmul.f32 0.01, %v1280_v21 }
 0x211   : > { %v1137_v50 = vadd.f32 %v1136_v17, %v1048_v20  ;;  %v1417_v29 = vmax.f32 %v1280_v21, %v1353_v27 }
 0x212   : > { %v1192_v10 = vpop.f32.mrf.mxu0 }
 0x213   : > { %v1281_v6 = vpop.f32.mrf.mxu1  ;;  %v1193_v49 = vadd.f32 %v1192_v10, %v2977_v22  ;;  %v1380_v30 = vmul.f32 0.01, %v1137_v50 }
 0x215   : > { %v1282_v15 = vadd.f32 %v1281_v6, %v1193_v49  ;;  %v1444_v25 = vmax.f32 %v1137_v50, %v1380_v30 }
 0x216   : > { %v1049_v11 = vpop.f32.mrf.mxu2 }
 0x217   : > { %v1138_v28 = vpop.f32.mrf.mxu3  ;;  %v1355_v51 = vmul.f32 0.01, %v1282_v15  ;;  %v1050_v58 = vadd.f32 %v1049_v11, %v2852_v40 }
 0x219   : > { %v1419_v35 = vmax.f32 %v1282_v15, %v1355_v51  ;;  %v1139_v62 = vadd.f32 %v1138_v28, %v1050_v58 }
 0x21a   : > { %v1195_v63 = vpop.f32.mrf.mxu0 }
 0x21b   : > { %v1284_v18 = vpop.f32.mrf.mxu1  ;;  %v1382_v33 = vmul.f32 0.01, %v1139_v62  ;;  %1659 = vmatmul.bf16.gmra.mxu2 %v2998_v8  ;;  %v1467_v19 = vpack.c.bf16 %v1419_v35, %v1417_v29  ;;  %v1196_v7 = vadd.f32 %v1195_v63, %v2977_v22 }
 0x21d   : > { %v1446_v26 = vmax.f32 %v1139_v62, %v1382_v33  ;;  %1748 = vmatmul.bf16.gmra.mxu3 %v1467_v19  ;;  %v1285_v47 = vadd.f32 %v1284_v18, %v1196_v7 }
 0x21e   : > { %v1052_v38 = vpop.f32.mrf.mxu2 }
 0x21f   : > { %v1141_v44 = vpop.f32.mrf.mxu3  ;;  %v1053_v45 = vadd.f32 %v1052_v38, %v2852_v40  ;;  %v3060_v46 = vpack.c.bf16 %v1446_v26, %v1444_v25  ;;  %v1357_v55 = vmul.f32 0.01, %v1285_v47 }
 0x221   : > { %v1142_v48 = vadd.f32 %v1141_v44, %v1053_v45  ;;  %v1421_v61 = vmax.f32 %v1285_v47, %v1357_v55 }
 0x222   : > { %v1197_v53 = vpop.f32.mrf.mxu0 }
 0x223   : > { %v1286_v54 = vpop.f32.mrf.mxu1  ;;  %v1198_v37 = vadd.f32 %v1197_v53, %v2977_v22  ;;  %v1384_v41 = vmul.f32 0.01, %v1142_v48 }
 0x225   : > { %v1287_v8 = vadd.f32 %v1286_v54, %v1198_v37  ;;  %v1448_v2 = vmax.f32 %v1142_v48, %v1384_v41 }
 0x226   : > { %v1054_v56 = vpop.f32.mrf.mxu2 }
 0x227   : > { %v1359_v57 = vmul.f32 0.01, %v1287_v8  ;;  %v1055_v34 = vadd.f32 %v1054_v56, %v2852_v40  ;;  %v1143_v60 = vpop.f32.mrf.mxu3 }
 0x229   : > { %v1423_v42 = vmax.f32 %v1287_v8, %v1359_v57  ;;  %v1144_v39 = vadd.f32 %v1143_v60, %v1055_v34 }
 0x22a   : > { %v1200_v43 = vpop.f32.mrf.mxu0 }
 0x22b   : > { %v1289_v0 = vpop.f32.mrf.mxu1  ;;  %v1386_v9 = vmul.f32 0.01, %v1144_v39  ;;  %1664 = vmatmul.bf16.gmra.mxu2 %v3008_v52  ;;  %v1469_v12 = vpack.c.bf16 %v1423_v42, %v1421_v61  ;;  %v1201_v40 = vadd.f32 %v1200_v43, %v2977_v22 }
 0x22d   : > { %v1450_v3 = vmax.f32 %v1144_v39, %v1386_v9  ;;  %1753 = vmatmul.bf16.gmra.mxu3 %v1469_v12  ;;  %v1290_v31 = vadd.f32 %v1289_v0, %v1201_v40 }
 0x22e   : > { %v1625_v13 = vpop.f32.mrf.mxu2 }
 0x22f   : > { %v1626_v14 = vadd.f32 %v3068_v1, %v1625_v13  ;;  %v3074_v4 = vpack.c.bf16 %v1450_v3, %v1448_v2  ;;  %v1361_v21 = vmul.f32 0.01, %v1290_v31 }
 0x230   : > { %v1714_v52 = vpop.f32.mrf.mxu3 }
 0x231   : > { %v1715_v32 = vadd.f32 %v1714_v52, %v1626_v14  ;;  %v1425_v27 = vmax.f32 %v1290_v31, %v1361_v21 }
 0x232   : > { %v1202_v16 = vpop.f32.mrf.mxu0 }
 0x233   : > { %v1291_v17 = vpop.f32.mrf.mxu1  ;;  %v1203_v20 = vadd.f32 %v1202_v16, %v2977_v22  ;;  %1794 = vst [vmem:[%s3077_s18] sm:$0xff] %v1715_v32 }
 0x235   : > { %v1292_v50 = vadd.f32 %v1291_v17, %v1203_v20 }
 0x236   : > { %v1627_v10 = vpop.f32.mrf.mxu2 }
 0x237   : > { %v1363_v6 = vmul.f32 0.01, %v1292_v50  ;;  %v1628_v49 = vadd.f32 %v3068_v1, %v1627_v10 }
 0x238   : > { %v1716_v11 = vpop.f32.mrf.mxu3 }
 0x239   : > { %v1427_v15 = vmax.f32 %v1292_v50, %v1363_v6  ;;  %v1717_v28 = vadd.f32 %v1716_v11, %v1628_v49 }
 0x23a   : > { %v1205_v51 = vpop.f32.mrf.mxu0 }
 0x23b   : > { %v1294_v58 = vpop.f32.mrf.mxu1  ;;  %1669 = vmatmul.bf16.gmra.mxu2 %v3017_v23  ;;  %v1471_v29 = vpack.c.bf16 %v1427_v15, %v1425_v27  ;;  %1795 = vst [vmem:[%s3077_s18 + $0x8] sm:$0xff] %v1717_v28  ;;  %v1206_v30 = vadd.f32 %v1205_v51, %v2977_v22 }
 0x23d   : > { %1758 = vmatmul.bf16.gmra.mxu3 %v1471_v29  ;;  %v1295_v63 = vadd.f32 %v1294_v58, %v1206_v30 }
 0x23e   : > { %v1630_v35 = vpop.f32.mrf.mxu2 }
 0x23f   : > { %v1631_v62 = vadd.f32 %v3068_v1, %v1630_v35  ;;  %v1365_v7 = vmul.f32 0.01, %v1295_v63 }
 0x240   : > { %v1719_v18 = vpop.f32.mrf.mxu3 }
 0x241   : > { %v1720_v33 = vadd.f32 %v1719_v18, %v1631_v62  ;;  %v1429_v47 = vmax.f32 %v1295_v63, %v1365_v7 }
 0x242   : > { %v1207_v19 = vpop.f32.mrf.mxu0 }
 0x243   : > { %v1296_v25 = vpop.f32.mrf.mxu1  ;;  %v1208_v26 = vadd.f32 %v1207_v19, %v2977_v22  ;;  %1796 = vst [vmem:[%s3077_s18 + $0x10] sm:$0xff] %v1720_v33 }
 0x245   : > { %v1297_v38 = vadd.f32 %v1296_v25, %v1208_v26 }
 0x246   : > { %v1632_v23 = vpop.f32.mrf.mxu2 }
 0x247   : > { %v1367_v44 = vmul.f32 0.01, %v1297_v38  ;;  %v1633_v45 = vadd.f32 %v3068_v1, %v1632_v23 }
 0x248   : > { %v1721_v53 = vpop.f32.mrf.mxu3 }
 0x249   : > { %v1431_v48 = vmax.f32 %v1297_v38, %v1367_v44  ;;  %v1722_v54 = vadd.f32 %v1721_v53, %v1633_v45 }
 0x24a   : > { %v1210_v37 = vpop.f32.mrf.mxu0 }
 0x24b   : > { %v1299_v55 = vpop.f32.mrf.mxu1  ;;  %1674 = vmatmul.bf16.gmra.mxu2 %v3026_v5  ;;  %v1473_v8 = vpack.c.bf16 %v1431_v48, %v1429_v47  ;;  %1797 = vst [vmem:[%s3077_s18 + $0x18] sm:$0xff] %v1722_v54  ;;  %v1211_v56 = vadd.f32 %v1210_v37, %v2977_v22 }
 0x24d   : > { %1763 = vmatmul.bf16.gmra.mxu3 %v1473_v8  ;;  %v1300_v60 = vadd.f32 %v1299_v55, %v1211_v56 }
 0x24e   : > { %v1635_v57 = vpop.f32.mrf.mxu2 }
 0x24f   : > { %v1636_v34 = vadd.f32 %v3068_v1, %v1635_v57  ;;  %v1369_v0 = vmul.f32 0.01, %v1300_v60 }
 0x250   : > { %v1724_v61 = vpop.f32.mrf.mxu3 }
 0x251   : > { %v1725_v41 = vadd.f32 %v1724_v61, %v1636_v34  ;;  %v1433_v3 = vmax.f32 %v1300_v60, %v1369_v0 }
 0x252   : > { %v1212_v42 = vpop.f32.mrf.mxu0 }
 0x253   : > { %v1301_v39 = vpop.f32.mrf.mxu1  ;;  %v1213_v43 = vadd.f32 %v1212_v42, %v2977_v22  ;;  %1798 = vst [vmem:[%s3077_s18 + $0x20] sm:$0xff] %v1725_v41 }
 0x255   : > { %v1302_v9 = vadd.f32 %v1301_v39, %v1213_v43 }
 0x256   : > { %v1637_v5 = vpop.f32.mrf.mxu2 }
 0x257   : > { %v1371_v12 = vmul.f32 0.01, %v1302_v9  ;;  %v1638_v2 = vadd.f32 %v3068_v1, %v1637_v5 }
 0x258   : > { %v1726_v13 = vpop.f32.mrf.mxu3 }
 0x259   : > { %v1435_v40 = vmax.f32 %v1302_v9, %v1371_v12  ;;  %v1727_v14 = vadd.f32 %v1726_v13, %v1638_v2 }
 0x25a   : > { %v1215_v31 = vpop.f32.mrf.mxu0 }
 0x25b   : > { %v1304_v52 = vpop.f32.mrf.mxu1  ;;  %1679 = vmatmul.bf16.gmra.mxu2 %v3035_v59  ;;  %v1475_v32 = vpack.c.bf16 %v1435_v40, %v1433_v3  ;;  %1799 = vst [vmem:[%s3077_s18 + $0x28] sm:$0xff] %v1727_v14  ;;  %v1216_v16 = vadd.f32 %v1215_v31, %v2977_v22 }
 0x25d   : > { %1768 = vmatmul.bf16.gmra.mxu3 %v1475_v32  ;;  %v1305_v21 = vadd.f32 %v1304_v52, %v1216_v16 }
 0x25e   : > { %v1640_v17 = vpop.f32.mrf.mxu2 }
 0x25f   : > { %v1641_v20 = vadd.f32 %v3068_v1, %v1640_v17  ;;  %v1373_v15 = vmul.f32 0.01, %v1305_v21 }
 0x260   : > { %v1729_v50 = vpop.f32.mrf.mxu3 }
 0x261   : > { %v1730_v10 = vadd.f32 %v1729_v50, %v1641_v20  ;;  %v1437_v58 = vmax.f32 %v1305_v21, %v1373_v15 }
 0x262   : > { %v1217_v6 = vpop.f32.mrf.mxu0 }
 0x263   : > { %v1306_v49 = vpop.f32.mrf.mxu1  ;;  %v1218_v27 = vadd.f32 %v1217_v6, %v2977_v22  ;;  %1800 = vst [vmem:[%s3077_s18 + $0x30] sm:$0xff] %v1730_v10 }
 0x265   : > { %v1307_v11 = vadd.f32 %v1306_v49, %v1218_v27 }
 0x266   : > { %v1642_v59 = vpop.f32.mrf.mxu2 }
 0x267   : > { %v1375_v28 = vmul.f32 0.01, %v1307_v11  ;;  %v1643_v51 = vadd.f32 %v3068_v1, %v1642_v59 }
 0x268   : > { %v1731_v30 = vpop.f32.mrf.mxu3 }
 0x269   : > { %v1439_v29 = vmax.f32 %v1307_v11, %v1375_v28  ;;  %v1732_v35 = vadd.f32 %v1731_v30, %v1643_v51 }
 0x26a   : > { %v1220_v62 = vpop.f32.mrf.mxu0 }
 0x26b   : > { %v1309_v63 = vpop.f32.mrf.mxu1  ;;  %1684 = vmatmul.bf16.gmra.mxu2 %v3044_v36  ;;  %v1477_v18 = vpack.c.bf16 %v1439_v29, %v1437_v58  ;;  %1801 = vst [vmem:[%s3077_s18 + $0x38] sm:$0xff] %v1732_v35  ;;  %v1221_v33 = vadd.f32 %v1220_v62, %v2977_v22 }
 0x26d   : > { %1773 = vmatmul.bf16.gmra.mxu3 %v1477_v18  ;;  %v1310_v26 = vadd.f32 %v1309_v63, %v1221_v33 }
 0x26e   : > { %v1645_v19 = vpop.f32.mrf.mxu2 }
 0x26f   : > { %v1646_v25 = vadd.f32 %v3068_v1, %v1645_v19  ;;  %v1377_v47 = vmul.f32 0.01, %v1310_v26 }
 0x270   : > { %v1734_v7 = vpop.f32.mrf.mxu3 }
 0x271   : > { %v1735_v38 = vadd.f32 %v1734_v7, %v1646_v25  ;;  %v1441_v37 = vmax.f32 %v1310_v26, %v1377_v47 }
 0x272   : > { %v1222_v23 = vpop.f32.mrf.mxu0 }
 0x273   : > { %v1311_v44 = vpop.f32.mrf.mxu1  ;;  %v1223_v45 = vadd.f32 %v1222_v23, %v2977_v22  ;;  %1802 = vst [vmem:[%s3077_s18 + $0x40] sm:$0xff] %v1735_v38 }
 0x275   : > { %v1312_v48 = vadd.f32 %v1311_v44, %v1223_v45 }
 0x276   : > { %v1647_v36 = vpop.f32.mrf.mxu2 }
 0x277   : > { %v1379_v53 = vmul.f32 0.01, %v1312_v48  ;;  %v1648_v54 = vadd.f32 %v3068_v1, %v1647_v36 }
 0x278   : > { %v1736_v8 = vpop.f32.mrf.mxu3 }
 0x279   : > { %v1443_v55 = vmax.f32 %v1312_v48, %v1379_v53  ;;  %v1737_v56 = vadd.f32 %v1736_v8, %v1648_v54 }
 0x27a   : > { %v1225_v57 = vpop.f32.mrf.mxu0 }
 0x27b   : > { %v1314_v34 = vpop.f32.mrf.mxu1  ;;  %1689 = vmatmul.bf16.gmra.mxu2 %v3053_v24  ;;  %v1479_v60 = vpack.c.bf16 %v1443_v55, %v1441_v37  ;;  %1803 = vst [vmem:[%s3077_s18 + $0x48] sm:$0xff] %v1737_v56  ;;  %v1226_v61 = vadd.f32 %v1225_v57, %v2977_v22 }
 0x27d   : > { %1778 = vmatmul.bf16.gmra.mxu3 %v1479_v60  ;;  %v1315_v39 = vadd.f32 %v1314_v34, %v1226_v61 }
 0x27e   : > { %v1650_v41 = vpop.f32.mrf.mxu2 }
 0x27f   : > { %v1651_v42 = vadd.f32 %v3068_v1, %v1650_v41  ;;  %v1381_v2 = vmul.f32 0.01, %v1315_v39 }
 0x280   : > { %v1739_v43 = vpop.f32.mrf.mxu3 }
 0x281   : > { %v1740_v0 = vadd.f32 %v1739_v43, %v1651_v42  ;;  %v1445_v14 = vmax.f32 %v1315_v39, %v1381_v2 }
 0x282   : > { %v1227_v9 = vpop.f32.mrf.mxu0 }
 0x283   : > { %v1316_v5 = vpop.f32.mrf.mxu1  ;;  %v1228_v12 = vadd.f32 %v1227_v9, %v2977_v22  ;;  %1804 = vst [vmem:[%s3077_s18 + $0x50] sm:$0xff] %v1740_v0 }
 0x285   : > { %v1317_v3 = vadd.f32 %v1316_v5, %v1228_v12 }
 0x286   : > { %v1652_v24 = vpop.f32.mrf.mxu2 }
 0x287   : > { %v1383_v40 = vmul.f32 0.01, %v1317_v3  ;;  %v1653_v13 = vadd.f32 %v3068_v1, %v1652_v24 }
 0x288   : > { %v1741_v52 = vpop.f32.mrf.mxu3 }
 0x289   : > { %v1447_v31 = vmax.f32 %v1317_v3, %v1383_v40  ;;  %v1742_v32 = vadd.f32 %v1741_v52, %v1653_v13 }
 0x28a   : > { %v1230_v16 = vpop.f32.mrf.mxu0 }
 0x28b   : > { %v1319_v17 = vpop.f32.mrf.mxu1  ;;  %1694 = vmatmul.bf16.gmra.mxu2 %v3060_v46  ;;  %v1481_v20 = vpack.c.bf16 %v1447_v31, %v1445_v14  ;;  %1805 = vst [vmem:[%s3077_s18 + $0x58] sm:$0xff] %v1742_v32  ;;  %v1231_v21 = vadd.f32 %v1230_v16, %v2977_v22 }
 0x28d   : > { %1783 = vmatmul.bf16.gmra.mxu3 %v1481_v20  ;;  %v1320_v6 = vadd.f32 %v1319_v17, %v1231_v21 }
 0x28e   : > { %v1655_v50 = vpop.f32.mrf.mxu2 }
 0x28f   : > { %v1656_v10 = vadd.f32 %v3068_v1, %v1655_v50  ;;  %v1385_v28 = vmul.f32 0.01, %v1320_v6 }
 0x290   : > { %v1744_v49 = vpop.f32.mrf.mxu3 }
 0x291   : > { %v1745_v27 = vadd.f32 %v1744_v49, %v1656_v10  ;;  %v1449_v30 = vmax.f32 %v1320_v6, %v1385_v28 }
 0x292   : > { %v1232_v15 = vpop.f32.mrf.mxu0 }
 0x293   : > { %v1233_v11 = vadd.f32 %v1232_v15, %v2977_v22  ;;  %1806 = vst [vmem:[%s3077_s18 + $0x60] sm:$0xff] %v1745_v27  ;;  %v1321_v59 = vpop.f32.mrf.mxu1 }
 0x295   : > { %v1322_v51 = vadd.f32 %v1321_v59, %v1233_v11 }
 0x296   : > { %v1657_v46 = vpop.f32.mrf.mxu2 }
 0x297   : > { %v1387_v58 = vmul.f32 0.01, %v1322_v51  ;;  %v1658_v29 = vadd.f32 %v3068_v1, %v1657_v46 }
 0x298   : > { %v1746_v62 = vpop.f32.mrf.mxu3 }
 0x299   : > { %v1451_v35 = vmax.f32 %v1322_v51, %v1387_v58  ;;  %v1747_v63 = vadd.f32 %v1746_v62, %v1658_v29 }
 0x29b   : > { %1699 = vmatmul.bf16.gmra.mxu2 %v3074_v4  ;;  %v1483_v18 = vpack.c.bf16 %v1451_v35, %v1449_v30  ;;  %1807 = vst [vmem:[%s3077_s18 + $0x68] sm:$0xff] %v1747_v63 }
 0x29d   : > { %1788 = vmatmul.bf16.gmra.mxu3 %v1483_v18 }
 0x29e   : > { %v1660_v22 = vpop.f32.mrf.mxu2 }
 0x29f   : > { %v1661_v33 = vadd.f32 %v3068_v1, %v1660_v22 }
 0x2a0   : > { %v1749_v19 = vpop.f32.mrf.mxu3 }
 0x2a1   : > { %v1750_v25 = vadd.f32 %v1749_v19, %v1661_v33 }
 0x2a3   : > { %1808 = vst [vmem:[%s3077_s18 + $0x70] sm:$0xff] %v1750_v25 }
 0x2a6   : > { %v1662_v26 = vpop.f32.mrf.mxu2 }
 0x2a7   : > { %v1663_v7 = vadd.f32 %v3068_v1, %v1662_v26 }
 0x2a8   : > { %v1751_v38 = vpop.f32.mrf.mxu3 }
 0x2a9   : > { %v1752_v23 = vadd.f32 %v1751_v38, %v1663_v7 }
 0x2ab   : > { %1809 = vst [vmem:[%s3077_s18 + $0x78] sm:$0xff] %v1752_v23 }
 0x2ae   : > { %v1665_v44 = vpop.f32.mrf.mxu2 }
 0x2af   : > { %v1666_v4 = vadd.f32 %v3068_v1, %v1665_v44 }
 0x2b0   : > { %v1754_v45 = vpop.f32.mrf.mxu3 }
 0x2b1   : > { %v1755_v47 = vadd.f32 %v1754_v45, %v1666_v4 }
 0x2b3   : > { %1810 = vst [vmem:[%s3077_s18 + $0x80] sm:$0xff] %v1755_v47 }
 0x2b6   : > { %v1667_v48 = vpop.f32.mrf.mxu2 }
 0x2b7   : > { %v1668_v36 = vadd.f32 %v3068_v1, %v1667_v48 }
 0x2b8   : > { %v1756_v53 = vpop.f32.mrf.mxu3 }
 0x2b9   : > { %v1757_v54 = vadd.f32 %v1756_v53, %v1668_v36 }
 0x2bb   : > { %1811 = vst [vmem:[%s3077_s18 + $0x88] sm:$0xff] %v1757_v54 }
 0x2be   : > { %v1670_v37 = vpop.f32.mrf.mxu2 }
 0x2bf   : > { %v1671_v55 = vadd.f32 %v3068_v1, %v1670_v37 }
 0x2c0   : > { %v1759_v8 = vpop.f32.mrf.mxu3 }
 0x2c1   : > { %v1760_v56 = vadd.f32 %v1759_v8, %v1671_v55 }
 0x2c3   : > { %1812 = vst [vmem:[%s3077_s18 + $0x90] sm:$0xff] %v1760_v56 }
 0x2c6   : > { %v1672_v57 = vpop.f32.mrf.mxu2 }
 0x2c7   : > { %v1673_v34 = vadd.f32 %v3068_v1, %v1672_v57 }
 0x2c8   : > { %v1761_v60 = vpop.f32.mrf.mxu3 }
 0x2c9   : > { %v1762_v61 = vadd.f32 %v1761_v60, %v1673_v34 }
 0x2cb   : > { %1813 = vst [vmem:[%s3077_s18 + $0x98] sm:$0xff] %v1762_v61 }
 0x2ce   : > { %v1675_v41 = vpop.f32.mrf.mxu2 }
 0x2cf   : > { %v1676_v42 = vadd.f32 %v3068_v1, %v1675_v41 }
 0x2d0   : > { %v1764_v39 = vpop.f32.mrf.mxu3 }
 0x2d1   : > { %v1765_v43 = vadd.f32 %v1764_v39, %v1676_v42 }
 0x2d3   : > { %1814 = vst [vmem:[%s3077_s18 + $0xa0] sm:$0xff] %v1765_v43 }
 0x2d6   : > { %v1677_v0 = vpop.f32.mrf.mxu2 }
 0x2d7   : > { %v1678_v9 = vadd.f32 %v3068_v1, %v1677_v0 }
 0x2d8   : > { %v1766_v5 = vpop.f32.mrf.mxu3 }
 0x2d9   : > { %v1767_v12 = vadd.f32 %v1766_v5, %v1678_v9 }
 0x2db   : > { %1815 = vst [vmem:[%s3077_s18 + $0xa8] sm:$0xff] %v1767_v12 }
 0x2de   : > { %v1680_v2 = vpop.f32.mrf.mxu2 }
 0x2df   : > { %v1681_v3 = vadd.f32 %v3068_v1, %v1680_v2 }
 0x2e0   : > { %v1769_v24 = vpop.f32.mrf.mxu3 }
 0x2e1   : > { %v1770_v40 = vadd.f32 %v1769_v24, %v1681_v3 }
 0x2e3   : > { %1816 = vst [vmem:[%s3077_s18 + $0xb0] sm:$0xff] %v1770_v40 }
 0x2e6   : > { %v1682_v13 = vpop.f32.mrf.mxu2 }
 0x2e7   : > { %v1683_v14 = vadd.f32 %v3068_v1, %v1682_v13 }
 0x2e8   : > { %v1771_v31 = vpop.f32.mrf.mxu3 }
 0x2e9   : > { %v1772_v52 = vadd.f32 %v1771_v31, %v1683_v14 }
 0x2eb   : > { %1817 = vst [vmem:[%s3077_s18 + $0xb8] sm:$0xff] %v1772_v52 }
 0x2ee   : > { %v1685_v32 = vpop.f32.mrf.mxu2 }
 0x2ef   : > { %v1686_v16 = vadd.f32 %v3068_v1, %v1685_v32 }
 0x2f0   : > { %v1774_v17 = vpop.f32.mrf.mxu3 }
 0x2f1   : > { %v1775_v20 = vadd.f32 %v1774_v17, %v1686_v16 }
 0x2f3   : > { %1818 = vst [vmem:[%s3077_s18 + $0xc0] sm:$0xff] %v1775_v20 }
 0x2f6   : > { %v1687_v21 = vpop.f32.mrf.mxu2 }
 0x2f7   : > { %v1688_v50 = vadd.f32 %v3068_v1, %v1687_v21 }
 0x2f8   : > { %v1776_v10 = vpop.f32.mrf.mxu3 }
 0x2f9   : > { %v1777_v6 = vadd.f32 %v1776_v10, %v1688_v50 }
 0x2fb   : > { %1819 = vst [vmem:[%s3077_s18 + $0xc8] sm:$0xff] %v1777_v6 }
 0x2fe   : > { %v1690_v49 = vpop.f32.mrf.mxu2 }
 0x2ff   : > { %v1691_v27 = vadd.f32 %v3068_v1, %v1690_v49 }
 0x300   : > { %v1779_v15 = vpop.f32.mrf.mxu3 }
 0x301   : > { %v1780_v11 = vadd.f32 %v1779_v15, %v1691_v27 }
 0x303   : > { %1820 = vst [vmem:[%s3077_s18 + $0xd0] sm:$0xff] %v1780_v11 }
 0x306   : > { %v1692_v59 = vpop.f32.mrf.mxu2 }
 0x307   : > { %v1693_v28 = vadd.f32 %v3068_v1, %v1692_v59 }
 0x308   : > { %v1781_v51 = vpop.f32.mrf.mxu3 }
 0x309   : > { %v1782_v46 = vadd.f32 %v1781_v51, %v1693_v28 }
 0x30b   : > { %1821 = vst [vmem:[%s3077_s18 + $0xd8] sm:$0xff] %v1782_v46 }
 0x30e   : > { %v1695_v58 = vpop.f32.mrf.mxu2 }
 0x30f   : > { %v1696_v29 = vadd.f32 %v3068_v1, %v1695_v58 }
 0x310   : > { %v1784_v30 = vpop.f32.mrf.mxu3 }
 0x311   : > { %v1785_v35 = vadd.f32 %v1784_v30, %v1696_v29 }
 0x313   : > { %1822 = vst [vmem:[%s3077_s18 + $0xe0] sm:$0xff] %v1785_v35 }
 0x316   : > { %v1697_v62 = vpop.f32.mrf.mxu2 }
 0x317   : > { %v1698_v63 = vadd.f32 %v3068_v1, %v1697_v62 }
 0x318   : > { %v1786_v18 = vpop.f32.mrf.mxu3 }
 0x319   : > { %v1787_v22 = vadd.f32 %v1786_v18, %v1698_v63 }
 0x31b   : > { %1823 = vst [vmem:[%s3077_s18 + $0xe8] sm:$0xff] %v1787_v22 }
 0x31e   : > { %v1700_v33 = vpop.f32.mrf.mxu2 }
 0x31f   : > { %v1701_v19 = vadd.f32 %v3068_v1, %v1700_v33 }
 0x320   : > { %v1789_v25 = vpop.f32.mrf.mxu3 }
 0x321   : > { %v1790_v26 = vadd.f32 %v1789_v25, %v1701_v19 }
 0x323   : > { %1824 = vst [vmem:[%s3077_s18 + $0xf0] sm:$0xff] %v1790_v26 }
 0x326   : > { %v1702_v7 = vpop.f32.mrf.mxu2 }
 0x327   : > { %v1703_v38 = vadd.f32 %v3068_v1, %v1702_v7  ;;  %1833 = sbr.rel (!%p2417_p5) target bundleno = 844 (0x34c), region = 52 }
 0x328   : > { %v1791_v23 = vpop.f32.mrf.mxu3 }
 0x329   : > { %v1792_v44 = vadd.f32 %v1791_v23, %v1703_v38 }
 0x32b   : > { %1825 = vst [vmem:[%s3077_s18 + $0xf8] sm:$0xff] %v1792_v44 }
 0x32c   : > { %s3242_s20 = smov (!%p1836_p11, %s1835_s20), 32 }
 0x32d   : > { %s2160_s21 = sshll.u32 %s3242_s20, 3 }
 0x32e   : > { %s1839_s14 = ssub.s32 256, %s2160_s21 }
 0x32f   : > { %s1840_s22 = sshll.u32 %s1839_s14, 4 }
 0x330   : > { %1841 = vsyncadd %s3163_s19, %s1840_s22  ;;  %p3172_p12 = scmp.ne.s32.totalorder %s2160_s21, 0  ;;  %s2219_s11 = sshll.u32 %s2400_s28, 8 }
 0x331   : > { %s1844_s8 = scalar_lea.hbm %s3231_s7, %s2219_s11  ;;  %s1846_s9 = sshll.u32 %s3077_s18, 4  ;;  %s3181_s9 = int_to_ptr.vmem [resolvable:$true] %s1846_s9 }
 0x332   : > { %s1848_s13 = sshll.u32 %s1844_s8, 4  ;;  %s3232_s16 = sshll.u32 %s3242_s20, 7  ;;  %s3183_s13 = int_to_ptr.hbm [resolvable:$true] %s1848_s13 }
 0x333   : > { %s2261_s17 = sshra.s32 %s3181_s9, 4  ;;  %s2263_s21 = sshrl.u32 %s3232_s16, 4  ;;  %s2262_s17 = int_to_ptr.vmem [resolvable:$true] %s2261_s17 }
 0x334   : > { %s2268_s14 = scalar_lea.vmem %s2262_s17, %s2263_s21  ;;  %s2336_s28 = smov [#allocation2]  }
 0x335   : > { %p2269_p13 = scmp.ne.s32.totalorder %s2262_s17, %s2268_s14  ;;  %s2272_s22 = scalar_lea.vmem %s2336_s28, 512 }
 0x336   : > { %p2274_p2 = scmp.lt.s32.totalorder %s2272_s22, %s2268_s14 }
 0x337   : > { %p2270_p0 = pnand %p2269_p13, %p3172_p12 }
 0x339   : > { %p2271_p1 = pneg %p2270_p0 }
 0x33b   : > { %p2276_p3 = pnand %p2274_p2, %p2271_p1 }
 0x33d   : > { %2279 = shalt.err (!%p2276_p3)
}
 0x33e   : > { %s2280_s18 = sshra.s32 %s3183_s13, 4  ;;  %s2291_s8 = scalar_lea.hbm %s3231_s7, 1000  ;;  %s2281_s18 = int_to_ptr.hbm [resolvable:$true] %s2280_s18 }
 0x33f   : > { %s2287_s11 = scalar_lea.hbm %s2281_s18, %s2263_s21  ;;  %p2292_p8 = scmp.lt.s32.totalorder %s2281_s18, %s3231_s7 }
 0x340   : > { %p2288_p4 = scmp.ne.s32.totalorder %s2281_s18, %s2287_s11  ;;  %p2293_p9 = scmp.lt.s32.totalorder %s2291_s8, %s2287_s11 }
 0x342   : > { %p2289_p5 = pnand %p2288_p4, %p3172_p12  ;;  %p2294_p10 = por %p2293_p9, %p2292_p8 }
 0x344   : > { %p2290_p7 = pneg %p2289_p5 }
 0x346   : > { %p2295_p11 = pnand %p2294_p10, %p2290_p7 }
 0x348   : > { %2298 = shalt.err (!%p2295_p11)
}
 0x349   : > { %s2337_s14 = smov 128   ;;  %s2338_s21 = smov 8  }
 0x34a   : > { %s3236_s28 = sshll.u32 %s3242_s20, 7 }
 0x34b   : > { %1854 = dma.vmem_to_hbm [thread:$0]  (%p3172_p12), %s3181_s9, %s3236_s28, %s3183_s13, %s3163_s19, %s2337_s14, %s2337_s14, %s2338_s21  }
 0x34c PF: > { %p2225_p13 = scmp.ge.s32.totalorder %s2334_s27, 2  ;;  %s1863_s16 = sand.u32 1, %s2322_s24  }
 0x34d   : > { %s1864_s22 = scalar_lea.sflag [#allocation3], %s1863_s16 }
 0x34e   : > { %p2222_p0 = pnand %p2225_p13, %p2421_p6 }
 0x350   : > { %p2223_p1 = pneg %p2222_p0 }
 0x352   : > { %2317 = dma.done.wait (%p2223_p1), %s1864_s22, 4096  }
 0x353   : > { %2319 = vsyncadd (%p2223_p1), %s1864_s22, 4294963200  ;;  %p17_p2 = scmp.ge.s32.totalorder %s2404_s30, 6   ;;  %s3237_s24 = smov %s2326_s25 }
 0x354   : > { %s3238_s25 = smov %s2330_s26  ;;  %s3239_s26 = smov %s2415_s10 }
 0x355   : > { %s3240_s27 = smov %s2404_s30  ;;  %19 = sbr.rel (!%p17_p2) target bundleno = 3 (0x3), region = 83 }
 0x35a   :  { %1870 = vsyncpa [#allocation3], 1 }
 0x35b   :  { %1872 = vsyncpa [#allocation3 + $0x1], 1 }

</bundles_post_ra>
